<compile_context>
chip_gen: v6e
topology: v6e:2x2x1
jax: 0.10.0
libtpu: 0.0.40
codegen_flags: <defaults>
</compile_context>

<pallas_src>
import jax
import jax.numpy as jnp
from jax.experimental import pallas as pl
from jax.experimental.pallas import tpu as pltpu

# ----------------------------- model hyper-params -----------------------------
DIM_H = 32          # dim_h
NUM_J = 3
T_NUMBER = NUM_J + 1
SINGLE_OUT = DIM_H // T_NUMBER                # 8
SINGLE_OUT_LAST = DIM_H - NUM_J * SINGLE_OUT  # 8  (== SINGLE_OUT at these sizes)
TSO = T_NUMBER * SINGLE_OUT                   # 32 (== DIM_H)
N_NODES = 16        # nodes per graph
N_GRAPHS = 8        # graphs fused into one call -> M = 128 rows
BN_EPS = 1e-5

assert SINGLE_OUT == SINGLE_OUT_LAST, "stacked per-scale weights assume equal widths"
assert TSO == DIM_H


# --------------------------------- kernel ------------------------------------
def wave_layer_kernel(
    x_ref,      # [M, D]    node features, all graphs stacked (M = G*N = 128)
    gate_ref,   # [M, D]    per-node spectral gate, scale t repeated over its SO columns
    u_ref,      # [M, M]    block-diagonal eigenvector matrix U
    ut_ref,     # [M, M]    block-diagonal U^T (pre-transposed on the host)
    w_all_ref,  # [D, D]    stacked per-scale Linear weights (scale-major column blocks)
    b_all_ref,  # [1, D]    stacked per-scale Linear biases
    fus_w_ref,  # [D, D]
    fus_b_ref,  # [1, D]
    bn1_s_ref,  # [1, D]    folded BatchNorm1d (norm1_attn) scale
    bn1_b_ref,  # [1, D]    folded BatchNorm1d (norm1_attn) shift
    ff1_w_ref,  # [D, 2D]
    ff1_b_ref,  # [1, 2D]
    ff2_w_ref,  # [2D, D]
    ff2_b_ref,  # [1, D]
    bn2_s_ref,  # [1, D]    folded BatchNorm1d (norm2) scale
    bn2_b_ref,  # [1, D]    folded BatchNorm1d (norm2) shift
    out_ref,    # [M, D]
):
    x = x_ref[...]
    gate = gate_ref[...]
    u = u_ref[...]
    ut = ut_ref[...]

    def mm(a, b):
        return jnp.dot(a, b, preferred_element_type=jnp.float32)

    # ---- Wave_Conv_arxiv: all T scales and all G graphs fused into one chain ----
    h = mm(x, w_all_ref[...]) + b_all_ref[...]      # per-scale Linear (stacked)
    h = gate * mm(ut, h)                            # U^T ., spectral gate
    h = jnp.maximum(mm(u, h), 0.0)                  # act(U .), dropout = identity
    h = gate * mm(ut, h)                            # U^T ., spectral gate
    h = mm(u, h)                                    # U .   -> this IS `comb`

    # fusion + activation (dropout = identity)
    h_attn = jnp.maximum(mm(h, fus_w_ref[...]) + fus_b_ref[...], 0.0)

    # ---- WaveLayer glue: residual + BatchNorm1d (eval, folded) ----
    h = (x + h_attn) * bn1_s_ref[...] + bn1_b_ref[...]

    # ---- feed-forward block + residual + BatchNorm1d (eval, folded) ----
    ff = jnp.maximum(mm(h, ff1_w_ref[...]) + ff1_b_ref[...], 0.0)
    ff = mm(ff, ff2_w_ref[...]) + ff2_b_ref[...]
    out_ref[...] = (h + ff) * bn2_s_ref[...] + bn2_b_ref[...]


# --------------------------------- wrapper ------------------------------------
def wave_layer_forward(x, eigenvector, filter_signals_after, params):
    """x: [G, N, D], eigenvector: [G, N, N], filter_signals_after: [G, N, T]."""
    G, N, D = x.shape
    M = G * N
    f32 = jnp.float32

    # Fold graphs into the matmul M dimension.
    x_flat = x.reshape(M, D).astype(f32)

    # Column-expanded gate [M, T*SO]: sig[:, :, t] repeated across scale t's columns.
    gate = jnp.repeat(filter_signals_after.astype(f32), SINGLE_OUT, axis=-1).reshape(M, TSO)

    # Host-built block-diagonal U and (pre-transposed) U^T: exact, zero off-diagonals.
    evc = eigenvector.astype(f32)
    eye_g = jnp.eye(G, dtype=f32)
    u_bd = jnp.einsum('gh,gij->gihj', eye_g, evc).reshape(M, M)
    ut_bd = u_bd.T

    # Stacked per-scale Linear: column block t of W_all is lin_w[t] (scale-major).
    w_all = jnp.transpose(params["lin_w"], (1, 0, 2)).reshape(D, TSO)
    b_all = params["lin_b"].reshape(1, TSO)

    vmem = pl.BlockSpec(memory_space=pltpu.MemorySpace.VMEM)
    operands = (
        x_flat, gate, u_bd, ut_bd,
        w_all, b_all, params["fus_w"], params["fus_b"],
        params["bn1_s"], params["bn1_b"],
        params["ff1_w"], params["ff1_b"], params["ff2_w"], params["ff2_b"],
        params["bn2_s"], params["bn2_b"],
    )

    out_flat = pl.pallas_call(
        wave_layer_kernel,
        out_shape=jax.ShapeDtypeStruct((M, D), f32),
        in_specs=[vmem] * len(operands),
        out_specs=vmem,
    )(*operands)
    return out_flat.reshape(G, N, D)


# ------------------------- deterministic parameter init ------------------------
def init_params(key):
    ks = jax.random.split(key, 16)
    D, T, SO = DIM_H, T_NUMBER, SINGLE_OUT
    scale = 0.1

    def fold_bn(gamma, beta, mean, var):
        s = gamma / jnp.sqrt(var + BN_EPS)
        b = beta - mean * s
        return s.reshape(1, -1), b.reshape(1, -1)

    bn1 = fold_bn(1.0 + 0.1 * jax.random.normal(ks[8], (D,)),
                  0.1 * jax.random.normal(ks[9], (D,)),
                  0.1 * jax.random.normal(ks[10], (D,)),
                  0.5 + jnp.abs(jax.random.normal(ks[11], (D,))))
    bn2 = fold_bn(1.0 + 0.1 * jax.random.normal(ks[12], (D,)),
                  0.1 * jax.random.normal(ks[13], (D,)),
                  0.1 * jax.random.normal(ks[14], (D,)),
                  0.5 + jnp.abs(jax.random.normal(ks[15], (D,))))

    return dict(
        lin_w=scale * jax.random.normal(ks[0], (T, D, SO), jnp.float32),
        lin_b=scale * jax.random.normal(ks[1], (T, 1, SO), jnp.float32),
        fus_w=scale * jax.random.normal(ks[2], (D, D), jnp.float32),
        fus_b=scale * jax.random.normal(ks[3], (1, D), jnp.float32),
        ff1_w=scale * jax.random.normal(ks[4], (D, 2 * D), jnp.float32),
        ff1_b=scale * jax.random.normal(ks[5], (1, 2 * D), jnp.float32),
        ff2_w=scale * jax.random.normal(ks[6], (2 * D, D), jnp.float32),
        ff2_b=scale * jax.random.normal(ks[7], (1, D), jnp.float32),
        bn1_s=bn1[0], bn1_b=bn1[1],
        bn2_s=bn2[0], bn2_b=bn2[1],
    )


# ------------------------------ pure-JAX reference -----------------------------
def reference_forward_single(x, evc, sig, p):
    """Unfused per-scale reference matching the PyTorch module (single graph)."""
    parts = []
    for t in range(T_NUMBER):
        s_t = sig[:, t:t + 1]
        h = x @ p["lin_w"][t] + p["lin_b"][t]
        h = evc.T @ h
        h = s_t * h
        h = jnp.maximum(evc @ h, 0.0)
        h = evc.T @ h
        h = s_t * h
        h = evc @ h
        parts.append(h)
    comb = jnp.concatenate(parts, -1)
    h_attn = jnp.maximum(comb @ p["fus_w"] + p["fus_b"], 0.0)
    h = x + h_attn
    h = h * p["bn1_s"] + p["bn1_b"]
    ff = jnp.maximum(h @ p["ff1_w"] + p["ff1_b"], 0.0) @ p["ff2_w"] + p["ff2_b"]
    h = h + ff
    return h * p["bn2_s"] + p["bn2_b"]


# ----------------------------------- main --------------------------------------
if __name__ == "__main__":
    key = jax.random.PRNGKey(0)
    k_x, k_evc, k_sig, k_param = jax.random.split(key, 4)

    G, N, D, T = N_GRAPHS, N_NODES, DIM_H, T_NUMBER

    x = jax.random.normal(k_x, (G, N, D), jnp.float32)                   # batch.x (per graph)
    # deterministic orthonormal-ish eigenvector matrix per graph
    q, _ = jnp.linalg.qr(jax.random.normal(k_evc, (G, N, N), jnp.float32))
    eigenvector = q                                                      # batch.eigenvector
    # per-node / per-scale gate (== curr_signals[:, t, :] stacked on the last axis)
    filter_signals_after = jax.random.uniform(k_sig, (G, N, T), jnp.float32)

    params = init_params(k_param)

    out = wave_layer_forward(x, eigenvector, filter_signals_after, params)
    out = jax.block_until_ready(out)

    ref = jax.vmap(lambda xg, eg, sg: reference_forward_single(xg, eg, sg, params))(
        x, eigenvector, filter_signals_after)

    assert out.shape == (G, N, D)
    assert jnp.allclose(out, ref, atol=1e-4, rtol=1e-4), "mismatch vs JAX reference"

    print("KERNEL_OK")
</pallas_src>

<mosaic_0001>
module attributes {stable_mosaic.version = 11 : i64} {
  func.func @wave_layer_kernel(%arg0: memref<128x32xf32, #tpu.memory_space<vmem>>, %arg1: memref<128x32xf32, #tpu.memory_space<vmem>>, %arg2: memref<128x128xf32, #tpu.memory_space<vmem>>, %arg3: memref<128x128xf32, #tpu.memory_space<vmem>>, %arg4: memref<32x32xf32, #tpu.memory_space<vmem>>, %arg5: memref<1x32xf32, #tpu.memory_space<vmem>>, %arg6: memref<32x32xf32, #tpu.memory_space<vmem>>, %arg7: memref<1x32xf32, #tpu.memory_space<vmem>>, %arg8: memref<1x32xf32, #tpu.memory_space<vmem>>, %arg9: memref<1x32xf32, #tpu.memory_space<vmem>>, %arg10: memref<32x64xf32, #tpu.memory_space<vmem>>, %arg11: memref<1x64xf32, #tpu.memory_space<vmem>>, %arg12: memref<64x32xf32, #tpu.memory_space<vmem>>, %arg13: memref<1x32xf32, #tpu.memory_space<vmem>>, %arg14: memref<1x32xf32, #tpu.memory_space<vmem>>, %arg15: memref<1x32xf32, #tpu.memory_space<vmem>>, %arg16: memref<128x32xf32, #tpu.memory_space<vmem>>) attributes {dimension_semantics = [], scalar_prefetch = 0 : i64, scratch_operands = 0 : i64, tpu.core_type = #tpu.core_type<tc>} {
    %c0 = arith.constant 0 : index
    %c0_0 = arith.constant 0 : index
    %0 = vector.load %arg0[%c0, %c0_0] : memref<128x32xf32, #tpu.memory_space<vmem>>, vector<128x32xf32>
    %c0_1 = arith.constant 0 : index
    %c0_2 = arith.constant 0 : index
    %1 = vector.load %arg1[%c0_1, %c0_2] : memref<128x32xf32, #tpu.memory_space<vmem>>, vector<128x32xf32>
    %c0_3 = arith.constant 0 : index
    %c0_4 = arith.constant 0 : index
    %2 = vector.load %arg2[%c0_3, %c0_4] : memref<128x128xf32, #tpu.memory_space<vmem>>, vector<128x128xf32>
    %c0_5 = arith.constant 0 : index
    %c0_6 = arith.constant 0 : index
    %3 = vector.load %arg3[%c0_5, %c0_6] : memref<128x128xf32, #tpu.memory_space<vmem>>, vector<128x128xf32>
    %c0_7 = arith.constant 0 : index
    %c0_8 = arith.constant 0 : index
    %4 = vector.load %arg4[%c0_7, %c0_8] : memref<32x32xf32, #tpu.memory_space<vmem>>, vector<32x32xf32>
    %cst = arith.constant dense<0.000000e+00> : vector<128x32xf32>
    %5 = tpu.matmul %0, %4, %cst {dimension_numbers = #tpu.dot_dimension_numbers<[1], [0], [0], [1], [0, 0, 1, 1], [], []>} : vector<128x32xf32>, vector<32x32xf32>, vector<128x32xf32> -> vector<128x32xf32>
    %c0_9 = arith.constant 0 : index
    %c0_10 = arith.constant 0 : index
    %6 = vector.load %arg5[%c0_9, %c0_10] : memref<1x32xf32, #tpu.memory_space<vmem>>, vector<1x32xf32>
    %7 = vector.broadcast %6 : vector<1x32xf32> to vector<128x32xf32>
    %8 = arith.addf %5, %7 : vector<128x32xf32>
    %cst_11 = arith.constant dense<0.000000e+00> : vector<128x32xf32>
    %9 = tpu.matmul %3, %8, %cst_11 {dimension_numbers = #tpu.dot_dimension_numbers<[1], [0], [0], [1], [0, 0, 1, 1], [], []>} : vector<128x128xf32>, vector<128x32xf32>, vector<128x32xf32> -> vector<128x32xf32>
    %10 = arith.mulf %1, %9 : vector<128x32xf32>
    %cst_12 = arith.constant dense<0.000000e+00> : vector<128x32xf32>
    %11 = tpu.matmul %2, %10, %cst_12 {dimension_numbers = #tpu.dot_dimension_numbers<[1], [0], [0], [1], [0, 0, 1, 1], [], []>} : vector<128x128xf32>, vector<128x32xf32>, vector<128x32xf32> -> vector<128x32xf32>
    %cst_13 = arith.constant 0.000000e+00 : f32
    %12 = vector.broadcast %cst_13 : f32 to vector<128x32xf32>
    %13 = arith.maximumf %11, %12 : vector<128x32xf32>
    %cst_14 = arith.constant dense<0.000000e+00> : vector<128x32xf32>
    %14 = tpu.matmul %3, %13, %cst_14 {dimension_numbers = #tpu.dot_dimension_numbers<[1], [0], [0], [1], [0, 0, 1, 1], [], []>} : vector<128x128xf32>, vector<128x32xf32>, vector<128x32xf32> -> vector<128x32xf32>
    %15 = arith.mulf %1, %14 : vector<128x32xf32>
    %cst_15 = arith.constant dense<0.000000e+00> : vector<128x32xf32>
    %16 = tpu.matmul %2, %15, %cst_15 {dimension_numbers = #tpu.dot_dimension_numbers<[1], [0], [0], [1], [0, 0, 1, 1], [], []>} : vector<128x128xf32>, vector<128x32xf32>, vector<128x32xf32> -> vector<128x32xf32>
    %c0_16 = arith.constant 0 : index
    %c0_17 = arith.constant 0 : index
    %17 = vector.load %arg6[%c0_16, %c0_17] : memref<32x32xf32, #tpu.memory_space<vmem>>, vector<32x32xf32>
    %cst_18 = arith.constant dense<0.000000e+00> : vector<128x32xf32>
    %18 = tpu.matmul %16, %17, %cst_18 {dimension_numbers = #tpu.dot_dimension_numbers<[1], [0], [0], [1], [0, 0, 1, 1], [], []>} : vector<128x32xf32>, vector<32x32xf32>, vector<128x32xf32> -> vector<128x32xf32>
    %c0_19 = arith.constant 0 : index
    %c0_20 = arith.constant 0 : index
    %19 = vector.load %arg7[%c0_19, %c0_20] : memref<1x32xf32, #tpu.memory_space<vmem>>, vector<1x32xf32>
    %20 = vector.broadcast %19 : vector<1x32xf32> to vector<128x32xf32>
    %21 = arith.addf %18, %20 : vector<128x32xf32>
    %cst_21 = arith.constant 0.000000e+00 : f32
    %22 = vector.broadcast %cst_21 : f32 to vector<128x32xf32>
    %23 = arith.maximumf %21, %22 : vector<128x32xf32>
    %24 = arith.addf %0, %23 : vector<128x32xf32>
    %c0_22 = arith.constant 0 : index
    %c0_23 = arith.constant 0 : index
    %25 = vector.load %arg8[%c0_22, %c0_23] : memref<1x32xf32, #tpu.memory_space<vmem>>, vector<1x32xf32>
    %26 = vector.broadcast %25 : vector<1x32xf32> to vector<128x32xf32>
    %27 = arith.mulf %24, %26 : vector<128x32xf32>
    %c0_24 = arith.constant 0 : index
    %c0_25 = arith.constant 0 : index
    %28 = vector.load %arg9[%c0_24, %c0_25] : memref<1x32xf32, #tpu.memory_space<vmem>>, vector<1x32xf32>
    %29 = vector.broadcast %28 : vector<1x32xf32> to vector<128x32xf32>
    %30 = arith.addf %27, %29 : vector<128x32xf32>
    %c0_26 = arith.constant 0 : index
    %c0_27 = arith.constant 0 : index
    %31 = vector.load %arg10[%c0_26, %c0_27] : memref<32x64xf32, #tpu.memory_space<vmem>>, vector<32x64xf32>
    %cst_28 = arith.constant dense<0.000000e+00> : vector<128x64xf32>
    %32 = tpu.matmul %30, %31, %cst_28 {dimension_numbers = #tpu.dot_dimension_numbers<[1], [0], [0], [1], [0, 0, 1, 1], [], []>} : vector<128x32xf32>, vector<32x64xf32>, vector<128x64xf32> -> vector<128x64xf32>
    %c0_29 = arith.constant 0 : index
    %c0_30 = arith.constant 0 : index
    %33 = vector.load %arg11[%c0_29, %c0_30] : memref<1x64xf32, #tpu.memory_space<vmem>>, vector<1x64xf32>
    %34 = vector.broadcast %33 : vector<1x64xf32> to vector<128x64xf32>
    %35 = arith.addf %32, %34 : vector<128x64xf32>
    %cst_31 = arith.constant 0.000000e+00 : f32
    %36 = vector.broadcast %cst_31 : f32 to vector<128x64xf32>
    %37 = arith.maximumf %35, %36 : vector<128x64xf32>
    %c0_32 = arith.constant 0 : index
    %c0_33 = arith.constant 0 : index
    %38 = vector.load %arg12[%c0_32, %c0_33] : memref<64x32xf32, #tpu.memory_space<vmem>>, vector<64x32xf32>
    %cst_34 = arith.constant dense<0.000000e+00> : vector<128x32xf32>
    %39 = tpu.matmul %37, %38, %cst_34 {dimension_numbers = #tpu.dot_dimension_numbers<[1], [0], [0], [1], [0, 0, 1, 1], [], []>} : vector<128x64xf32>, vector<64x32xf32>, vector<128x32xf32> -> vector<128x32xf32>
    %c0_35 = arith.constant 0 : index
    %c0_36 = arith.constant 0 : index
    %40 = vector.load %arg13[%c0_35, %c0_36] : memref<1x32xf32, #tpu.memory_space<vmem>>, vector<1x32xf32>
    %41 = vector.broadcast %40 : vector<1x32xf32> to vector<128x32xf32>
    %42 = arith.addf %39, %41 : vector<128x32xf32>
    %43 = arith.addf %30, %42 : vector<128x32xf32>
    %c0_37 = arith.constant 0 : index
    %c0_38 = arith.constant 0 : index
    %44 = vector.load %arg14[%c0_37, %c0_38] : memref<1x32xf32, #tpu.memory_space<vmem>>, vector<1x32xf32>
    %45 = vector.broadcast %44 : vector<1x32xf32> to vector<128x32xf32>
    %46 = arith.mulf %43, %45 : vector<128x32xf32>
    %c0_39 = arith.constant 0 : index
    %c0_40 = arith.constant 0 : index
    %47 = vector.load %arg15[%c0_39, %c0_40] : memref<1x32xf32, #tpu.memory_space<vmem>>, vector<1x32xf32>
    %48 = vector.broadcast %47 : vector<1x32xf32> to vector<128x32xf32>
    %49 = arith.addf %46, %48 : vector<128x32xf32>
    %c0_41 = arith.constant 0 : index
    %c0_42 = arith.constant 0 : index
    %50 = vector.load %arg16[%c0_41, %c0_42] : memref<128x32xf32, #tpu.memory_space<vmem>>, vector<128x32xf32>
    tpu.vector_store %arg16[%c0_41, %c0_42], %49 {strides = array<i32>} : memref<128x32xf32, #tpu.memory_space<vmem>>, vector<128x32xf32>,
    return
  }
}

</mosaic_0001>

<bundles_post_ra>
// kernel: tpu_custom_call.1
= control target key start
LH: loop header
LB: loop body
LE: loop exit
PB: predicated region body
PF: predicated region fallthrough
CT: control target
= control target key end

     0   :  { %vm128_vm0 = vcmask 261120   ;;  %vm1467_vm1 = vcmask 523264   ;;  %s3348_s4 = inlined_call_operand.vmem [shape: f32[32,32], index: 4, kind: input, shape index: {}]   ;;  %s3349_s0 = inlined_call_operand.vmem [shape: f32[128,32], index: 0, kind: input, shape index: {}]   ;;  %s3350_s3 = inlined_call_operand.vmem [shape: f32[128,128], index: 3, kind: input, shape index: {}]   ;;  %s3351_s5 = inlined_call_operand.vmem [shape: f32[1,32], index: 5, kind: input, shape index: {}]   ;;  %s3352_s2 = inlined_call_operand.vmem [shape: f32[128,128], index: 2, kind: input, shape index: {}]   ;;  %s3353_s1 = inlined_call_operand.vmem [shape: f32[128,32], index: 1, kind: input, shape index: {}]   ;;  %s3354_s6 = inlined_call_operand.vmem [shape: f32[32,32], index: 6, kind: input, shape index: {}]   ;;  %s3355_s10 = inlined_call_operand.vmem [shape: f32[32,64], index: 10, kind: input, shape index: {}]   ;;  %s3356_s12 = inlined_call_operand.vmem [shape: f32[64,32], index: 12, kind: input, shape index: {}]   ;;  %s3357_s7 = inlined_call_operand.vmem [shape: f32[1,32], index: 7, kind: input, shape index: {}]   ;;  %s3358_s8 = inlined_call_operand.vmem [shape: f32[1,32], index: 8, kind: input, shape index: {}]   ;;  %s3359_s9 = inlined_call_operand.vmem [shape: f32[1,32], index: 9, kind: input, shape index: {}]   ;;  %s3360_s11 = inlined_call_operand.vmem [shape: f32[1,64], index: 11, kind: input, shape index: {}]   ;;  %s3361_s13 = inlined_call_operand.vmem [shape: f32[1,32], index: 13, kind: input, shape index: {}]   ;;  %s3362_s14 = inlined_call_operand.vmem [shape: f32[1,32], index: 14, kind: input, shape index: {}]   ;;  %s3363_s15 = inlined_call_operand.vmem [shape: f32[1,32], index: 15, kind: input, shape index: {}]   ;;  %s3364_s16 = inlined_call_operand.vmem [shape: f32[128,32], index: 16, kind: output, shape index: {}]  }
   0x1   :  { %3374 = sst [smem:[#allocation10_spill]] %s3348_s4  ;;  %v2502_v2 = vld [vmem:[%s3349_s0] sm:$0xff]  ;;  %v2515_v5 = vld [vmem:[%s3349_s0 + $0x8] sm:$0xff]  ;;  %v55_v6 = vld [vmem:[%s3349_s0 + $0x10] sm:$0xff] }
   0x2   :  { %s3375_s23 = sld [smem:[#allocation10_spill]]  ;;  %3376 = vst [vmem:[#allocation2_spill] sm:$0xff] %v2502_v2  ;;  %2035 = vmatprep.mubr.msk.f32.mxu0 %vm128_vm0, %v2502_v2  ;;  %3377 = vst [vmem:[#allocation3_spill] sm:$0xff] %v2515_v5  ;;  %v2526_v7 = vld [vmem:[%s3349_s0 + $0x18] sm:$0xff]  ;;  %v57_v8 = vld [vmem:[%s3349_s0 + $0x20] sm:$0xff] }
   0x3   :  { %3378 = vst [vmem:[#allocation4_spill] sm:$0xff] %v2526_v7  ;;  %v58_v9 = vld [vmem:[%s3349_s0 + $0x28] sm:$0xff]  ;;  %v59_v10 = vld [vmem:[%s3349_s0 + $0x30] sm:$0xff]  ;;  %v60_v11 = vld [vmem:[%s3349_s0 + $0x38] sm:$0xff] }
   0x4   :  { %v61_v12 = vld [vmem:[%s3349_s0 + $0x40] sm:$0xff]  ;;  %v62_v13 = vld [vmem:[%s3349_s0 + $0x48] sm:$0xff]  ;;  %v63_v14 = vld [vmem:[%s3349_s0 + $0x50] sm:$0xff] }
   0x5   :  { %v64_v15 = vld [vmem:[%s3349_s0 + $0x58] sm:$0xff]  ;;  %v65_v16 = vld [vmem:[%s3349_s0 + $0x60] sm:$0xff]  ;;  %v66_v17 = vld [vmem:[%s3349_s0 + $0x68] sm:$0xff] }
   0x6   :  { %v67_v18 = vld [vmem:[%s3349_s0 + $0x70] sm:$0xff]  ;;  %v68_v19 = vld [vmem:[%s3349_s0 + $0x78] sm:$0xff]  ;;  %v2581_v20 = vld [vmem:[%s3350_s3] sm:$0xff] }
   0x7   :  { %2091 = vmatprep.mubr.f32.mxu1 %v2581_v20  ;;  %v1743_v35 = vld [vmem:[%s3351_s5] ss:$0 sm:$0xff]  ;;  %v2590_v54 = vld [vmem:[%s3350_s3 + $0x8] sm:$0xff]  ;;  %v2595_v55 = vld [vmem:[%s3350_s3 + $0x10] sm:$0xff] }
   0x8   :  { %v120_v0 = vld [vmem:[%s3375_s23 + $0x18] sm:$0xff]  ;;  %v119_v1 = vld [vmem:[%s3375_s23 + $0x10] sm:$0xff]  ;;  %v118_v3 = vld [vmem:[%s3375_s23 + $0x8] sm:$0xff] }
   0x9   :  { %2027 = vmatprep.subr.mxu0 %v120_v0  ;;  %v117_v4 = vld [vmem:[%s3375_s23] sm:$0xff]  ;;  %v2602_v56 = vld [vmem:[%s3350_s3 + $0x18] sm:$0xff]  ;;  %v2614_v58 = vld [vmem:[%s3350_s3 + $0x28] sm:$0xff] }
   0xa   :  { %2028 = vmatpush3.msra.mxu0 %v120_v0  ;;  %v2607_v57 = vld [vmem:[%s3350_s3 + $0x20] sm:$0xff]  ;;  %v2619_v59 = vld [vmem:[%s3350_s3 + $0x30] sm:$0xff]  ;;  %v2626_v60 = vld [vmem:[%s3350_s3 + $0x38] sm:$0xff] }
   0xb   :  { %2029 = vmatprep.subr.mxu0 %v119_v1  ;;  %v2631_v61 = vld [vmem:[%s3350_s3 + $0x40] sm:$0xff]  ;;  %v2638_v62 = vld [vmem:[%s3350_s3 + $0x48] sm:$0xff]  ;;  %v2643_v63 = vld [vmem:[%s3350_s3 + $0x50] sm:$0xff] }
   0xc   :  { %2030 = vmatpush3.msra.mxu0 %v119_v1  ;;  %v2650_v0 = vld [vmem:[%s3350_s3 + $0x58] sm:$0xff]  ;;  %v2655_v1 = vld [vmem:[%s3350_s3 + $0x60] sm:$0xff] }
   0xd   :  { %2031 = vmatprep.subr.mxu0 %v118_v3 }
   0xe   :  { %2032 = vmatpush3.msra.mxu0 %v118_v3  ;;  %v2662_v3 = vld [vmem:[%s3350_s3 + $0x68] sm:$0xff] }
   0xf   :  { %2033 = vmatprep.subr.mxu0 %v117_v4 }
  0x10   :  { %2034 = vmatpush3.msra.mxu0 %v117_v4  ;;  %v2667_v4 = vld [vmem:[%s3350_s3 + $0x70] sm:$0xff] }
  0x11   :  { %2036 = vmatmul.mubr.msk.f32.vlgmr.msra.gmra.mxu0 %vm128_vm0, %v2515_v5 }
  0x12   :  { %2038 = vmatprep.mubr.msk.f32.mxu0 %vm128_vm0, %v55_v6  ;;  %v2674_v6 = vld [vmem:[%s3350_s3 + $0x78] sm:$0xff] }
  0x15   :  { %2039 = vmatmul.mubr.msk.f32.gmra.mxu0 %vm128_vm0, %v2526_v7 }
  0x16   :  { %2041 = vmatprep.mubr.msk.f32.mxu0 %vm128_vm0, %v57_v8  ;;  %v2681_v8 = vld [vmem:[%s3352_s2] sm:$0xff] }
  0x19   :  { %2042 = vmatmul.mubr.msk.f32.gmra.mxu0 %vm128_vm0, %v58_v9 }
  0x1a   :  { %2044 = vmatprep.mubr.msk.f32.mxu0 %vm128_vm0, %v59_v10 }
  0x1d   :  { %2045 = vmatmul.mubr.msk.f32.gmra.mxu0 %vm128_vm0, %v60_v11 }
  0x1e   :  { %2047 = vmatprep.mubr.msk.f32.mxu0 %vm128_vm0, %v61_v12 }
  0x21   :  { %2048 = vmatmul.mubr.msk.f32.gmra.mxu0 %vm128_vm0, %v62_v13 }
  0x22   :  { %2050 = vmatprep.mubr.msk.f32.mxu0 %vm128_vm0, %v63_v14 }
  0x25   :  { %2051 = vmatmul.mubr.msk.f32.gmra.mxu0 %vm128_vm0, %v64_v15 }
  0x26   :  { %2053 = vmatprep.mubr.msk.f32.mxu0 %vm128_vm0, %v65_v16 }
  0x29   :  { %2054 = vmatmul.mubr.msk.f32.gmra.mxu0 %vm128_vm0, %v66_v17 }
  0x2a   :  { %2056 = vmatprep.mubr.msk.f32.mxu0 %vm128_vm0, %v67_v18 }
  0x2d   :  { %2057 = vmatmul.mubr.msk.f32.gmra.mxu0 %vm128_vm0, %v68_v19 }
  0x2e   :  { %2147 = vmatprep.mubr.f32.mxu0 %v2681_v8 }
  0xd1   :  { %v2037_v21 = vpop.f32.mrf.mxu0 }
  0xd2   :  { %v249_v52 = vadd.f32 %v2037_v21, %v1743_v35 }
  0xd3   :  { %v243_v22 = vpop.f32.mrf.mxu0 }
  0xd4   :  { %v244_v53 = vadd.f32 %v1743_v35, %v243_v22 }
  0xd5   :  { %v2040_v23 = vpop.f32.mrf.mxu0 }
  0xd6   :  { %v259_v50 = vadd.f32 %v2040_v23, %v1743_v35  ;;  %v2695_v23 = vld [vmem:[%s3353_s1 + $0x78] sm:$0xff] }
  0xd7   :  { %v253_v24 = vpop.f32.mrf.mxu0 }
  0xd8   :  { %v254_v51 = vadd.f32 %v1743_v35, %v253_v24 }
  0xd9   :  { %v2043_v25 = vpop.f32.mrf.mxu0 }
  0xda   :  { %v269_v48 = vadd.f32 %v2043_v25, %v1743_v35  ;;  %v2700_v25 = vld [vmem:[%s3353_s1 + $0x70] sm:$0xff] }
  0xdb   :  { %v263_v26 = vpop.f32.mrf.mxu0 }
  0xdc   :  { %v264_v49 = vadd.f32 %v1743_v35, %v263_v26 }
  0xdd   :  { %v2046_v27 = vpop.f32.mrf.mxu0 }
  0xde   :  { %v279_v46 = vadd.f32 %v2046_v27, %v1743_v35  ;;  %v2706_v27 = vld [vmem:[%s3353_s1 + $0x68] sm:$0xff] }
  0xdf   :  { %v273_v28 = vpop.f32.mrf.mxu0 }
  0xe0   :  { %v274_v47 = vadd.f32 %v1743_v35, %v273_v28 }
  0xe1   :  { %v2049_v29 = vpop.f32.mrf.mxu0 }
  0xe2   :  { %v289_v44 = vadd.f32 %v2049_v29, %v1743_v35 }
  0xe3   :  { %v283_v30 = vpop.f32.mrf.mxu0 }
  0xe4   :  { %v284_v45 = vadd.f32 %v1743_v35, %v283_v30  ;;  %v2712_v30 = vld [vmem:[%s3353_s1 + $0x60] sm:$0xff] }
  0xe5   :  { %v2052_v31 = vpop.f32.mrf.mxu0 }
  0xe6   :  { %v299_v42 = vadd.f32 %v2052_v31, %v1743_v35 }
  0xe7   :  { %v293_v32 = vpop.f32.mrf.mxu0 }
  0xe8   :  { %v294_v43 = vadd.f32 %v1743_v35, %v293_v32  ;;  %v2718_v32 = vld [vmem:[%s3353_s1 + $0x58] sm:$0xff] }
  0xe9   :  { %v2055_v33 = vpop.f32.mrf.mxu0 }
  0xea   :  { %v309_v40 = vadd.f32 %v2055_v33, %v1743_v35 }
  0xeb   :  { %v303_v34 = vpop.f32.mrf.mxu0 }
  0xec   :  { %v304_v41 = vadd.f32 %v1743_v35, %v303_v34  ;;  %v2724_v34 = vld [vmem:[%s3353_s1 + $0x50] sm:$0xff] }
  0xed   :  { %v2058_v36 = vpop.f32.mrf.mxu0 }
  0xee   :  { %v319_v37 = vadd.f32 %v2058_v36, %v1743_v35  ;;  %v2730_v36 = vld [vmem:[%s3353_s1 + $0x48] sm:$0xff] }
  0xef   :  { %v313_v38 = vpop.f32.mrf.mxu0 }
  0xf0   :  { %v314_v39 = vadd.f32 %v1743_v35, %v313_v38  ;;  %2059 = vmatprep.subr.mxu1 %v319_v37  ;;  %v2736_v38 = vld [vmem:[%s3353_s1 + $0x40] sm:$0xff] }
  0xf1   :  { %2060 = vmatpush3.msra.mxu1 %v319_v37 }
  0xf2   :  { %2061 = vmatprep.subr.mxu1 %v314_v39 }
  0xf3   :  { %2062 = vmatpush3.msra.mxu1 %v314_v39 }
  0xf4   :  { %2063 = vmatprep.subr.mxu1 %v309_v40 }
  0xf5   :  { %2064 = vmatpush3.msra.mxu1 %v309_v40  ;;  %v2742_v40 = vld [vmem:[%s3353_s1 + $0x38] sm:$0xff] }
  0xf6   :  { %2065 = vmatprep.subr.mxu1 %v304_v41 }
  0xf7   :  { %2066 = vmatpush3.msra.mxu1 %v304_v41 }
  0xf8   :  { %2067 = vmatprep.subr.mxu1 %v299_v42 }
  0xf9   :  { %2068 = vmatpush3.msra.mxu1 %v299_v42  ;;  %v2748_v42 = vld [vmem:[%s3353_s1 + $0x30] sm:$0xff] }
  0xfa   :  { %2069 = vmatprep.subr.mxu1 %v294_v43 }
  0xfb   :  { %2070 = vmatpush3.msra.mxu1 %v294_v43 }
  0xfc   :  { %2071 = vmatprep.subr.mxu1 %v289_v44 }
  0xfd   :  { %2072 = vmatpush3.msra.mxu1 %v289_v44  ;;  %v2754_v44 = vld [vmem:[%s3353_s1 + $0x28] sm:$0xff] }
  0xfe   :  { %2073 = vmatprep.subr.mxu1 %v284_v45 }
  0xff   :  { %2074 = vmatpush3.msra.mxu1 %v284_v45 }
 0x100   :  { %2075 = vmatprep.subr.mxu1 %v279_v46 }
 0x101   :  { %2076 = vmatpush3.msra.mxu1 %v279_v46  ;;  %v2760_v46 = vld [vmem:[%s3353_s1 + $0x20] sm:$0xff] }
 0x102   :  { %2077 = vmatprep.subr.mxu1 %v274_v47 }
 0x103   :  { %2078 = vmatpush3.msra.mxu1 %v274_v47 }
 0x104   :  { %2079 = vmatprep.subr.mxu1 %v269_v48 }
 0x105   :  { %2080 = vmatpush3.msra.mxu1 %v269_v48  ;;  %v2766_v48 = vld [vmem:[%s3353_s1 + $0x18] sm:$0xff] }
 0x106   :  { %2081 = vmatprep.subr.mxu1 %v264_v49 }
 0x107   :  { %2082 = vmatpush3.msra.mxu1 %v264_v49 }
 0x108   :  { %2083 = vmatprep.subr.mxu1 %v259_v50 }
 0x109   :  { %2084 = vmatpush3.msra.mxu1 %v259_v50  ;;  %v2772_v50 = vld [vmem:[%s3353_s1 + $0x10] sm:$0xff] }
 0x10a   :  { %2085 = vmatprep.subr.mxu1 %v254_v51 }
 0x10b   :  { %2086 = vmatpush3.msra.mxu1 %v254_v51 }
 0x10c   :  { %2087 = vmatprep.subr.mxu1 %v249_v52 }
 0x10d   :  { %2088 = vmatpush3.msra.mxu1 %v249_v52  ;;  %v2779_v52 = vld [vmem:[%s3353_s1 + $0x8] sm:$0xff] }
 0x10e   :  { %2089 = vmatprep.subr.mxu1 %v244_v53 }
 0x10f   :  { %2090 = vmatpush3.msra.mxu1 %v244_v53 }
 0x110   :  { %2092 = vmatmul.mubr.f32.vlgmr.msra.gmra.mxu1 %v2590_v54 }
 0x111   :  { %2094 = vmatprep.mubr.f32.mxu1 %v2595_v55 }
 0x114   :  { %2095 = vmatmul.mubr.f32.gmra.mxu1 %v2602_v56 }
 0x115   :  { %2097 = vmatprep.mubr.f32.mxu1 %v2607_v57 }
 0x118   :  { %2098 = vmatmul.mubr.f32.gmra.mxu1 %v2614_v58 }
 0x119   :  { %2100 = vmatprep.mubr.f32.mxu1 %v2619_v59 }
 0x11c   :  { %2101 = vmatmul.mubr.f32.gmra.mxu1 %v2626_v60 }
 0x11d   :  { %2103 = vmatprep.mubr.f32.mxu1 %v2631_v61 }
 0x120   :  { %2104 = vmatmul.mubr.f32.gmra.mxu1 %v2638_v62 }
 0x121   :  { %2106 = vmatprep.mubr.f32.mxu1 %v2643_v63 }
 0x124   :  { %2107 = vmatmul.mubr.f32.gmra.mxu1 %v2650_v0 }
 0x125   :  { %2109 = vmatprep.mubr.f32.mxu1 %v2655_v1 }
 0x128   :  { %2110 = vmatmul.mubr.f32.gmra.mxu1 %v2662_v3 }
 0x129   :  { %2112 = vmatprep.mubr.f32.mxu1 %v2667_v4 }
 0x12c   :  { %2113 = vmatmul.mubr.f32.gmra.mxu1 %v2674_v6 }
 0x12d   :  { %2203 = vmatprep.mubr.f32.mxu1 %v2581_v20 }
 0x1d0   :  { %v2684_v9 = vpop.f32.mrf.mxu1 }
 0x1d2   :  { %v2686_v10 = vpop.f32.mrf.mxu1 }
 0x1d4   :  { %v2688_v11 = vpop.f32.mrf.mxu1 }
 0x1d5   :  { %v470_v51 = vmul.f32 %v2688_v11, %v2766_v48  ;;  %v468_v11 = vmul.f32 %v2684_v9, %v2779_v52  ;;  %v2807_v9 = vld [vmem:[%s3352_s2 + $0x18] sm:$0xff] }
 0x1d6   :  { %v2690_v12 = vpop.f32.mrf.mxu1 }
 0x1d7   :  { %v469_v53 = vmul.f32 %v2690_v12, %v2772_v50  ;;  %v2795_v12 = vld [vmem:[%s3352_s2 + $0x8] sm:$0xff] }
 0x1d8   :  { %v2099_v13 = vpop.f32.mrf.mxu1 }
 0x1d9   :  { %v472_v47 = vmul.f32 %v2099_v13, %v2754_v44  ;;  %v2786_v13 = vld [vmem:[%s3353_s1] sm:$0xff] }
 0x1da   :  { %v408_v14 = vpop.f32.mrf.mxu1 }
 0x1db   :  { %v471_v49 = vmul.f32 %v408_v14, %v2760_v46  ;;  %v467_v14 = vmul.f32 %v2686_v10, %v2786_v13  ;;  %v2812_v10 = vld [vmem:[%s3352_s2 + $0x20] sm:$0xff] }
 0x1dc   :  { %v2102_v15 = vpop.f32.mrf.mxu1 }
 0x1dd   :  { %v474_v43 = vmul.f32 %v2102_v15, %v2742_v40  ;;  %v2800_v15 = vld [vmem:[%s3352_s2 + $0x10] sm:$0xff] }
 0x1de   :  { %v418_v16 = vpop.f32.mrf.mxu1 }
 0x1df   :  { %v473_v45 = vmul.f32 %v418_v16, %v2748_v42  ;;  %v2819_v16 = vld [vmem:[%s3352_s2 + $0x28] sm:$0xff] }
 0x1e0   :  { %v2105_v17 = vpop.f32.mrf.mxu1 }
 0x1e1   :  { %v476_v39 = vmul.f32 %v2105_v17, %v2730_v36  ;;  %v2824_v17 = vld [vmem:[%s3352_s2 + $0x30] sm:$0xff] }
 0x1e2   :  { %v428_v18 = vpop.f32.mrf.mxu1 }
 0x1e3   :  { %v475_v41 = vmul.f32 %v428_v18, %v2736_v38  ;;  %v2831_v18 = vld [vmem:[%s3352_s2 + $0x38] sm:$0xff] }
 0x1e4   :  { %v2108_v19 = vpop.f32.mrf.mxu1 }
 0x1e5   :  { %v478_v35 = vmul.f32 %v2108_v19, %v2718_v32  ;;  %v2836_v19 = vld [vmem:[%s3352_s2 + $0x40] sm:$0xff] }
 0x1e6   :  { %v438_v20 = vpop.f32.mrf.mxu1 }
 0x1e7   :  { %v477_v37 = vmul.f32 %v438_v20, %v2724_v34  ;;  %v2843_v20 = vld [vmem:[%s3352_s2 + $0x48] sm:$0xff] }
 0x1e8   :  { %v2111_v21 = vpop.f32.mrf.mxu1 }
 0x1e9   :  { %v480_v31 = vmul.f32 %v2111_v21, %v2706_v27  ;;  %v2848_v21 = vld [vmem:[%s3352_s2 + $0x50] sm:$0xff] }
 0x1ea   :  { %v448_v22 = vpop.f32.mrf.mxu1 }
 0x1eb   :  { %v479_v33 = vmul.f32 %v448_v22, %v2712_v30  ;;  %v2855_v22 = vld [vmem:[%s3352_s2 + $0x58] sm:$0xff] }
 0x1ec   :  { %v2114_v24 = vpop.f32.mrf.mxu1  ;;  %3379 = vst [vmem:[#allocation5_spill] sm:$0xff] %v2855_v22 }
 0x1ed   :  { %v482_v26 = vmul.f32 %v2114_v24, %v2695_v23  ;;  %v2860_v24 = vld [vmem:[%s3352_s2 + $0x60] sm:$0xff] }
 0x1ee   :  { %v458_v28 = vpop.f32.mrf.mxu1  ;;  %3380 = vst [vmem:[#allocation6_spill] sm:$0xff] %v2860_v24 }
 0x1ef   :  { %v481_v29 = vmul.f32 %v458_v28, %v2700_v25  ;;  %2115 = vmatprep.subr.mxu0 %v482_v26  ;;  %v2872_v28 = vld [vmem:[%s3352_s2 + $0x70] sm:$0xff] }
 0x1f0   :  { %2116 = vmatpush3.msra.mxu0 %v482_v26  ;;  %v2867_v26 = vld [vmem:[%s3352_s2 + $0x68] sm:$0xff]  ;;  %3382 = vst [vmem:[#allocation8_spill] sm:$0xff] %v2872_v28 }
 0x1f1   :  { %2117 = vmatprep.subr.mxu0 %v481_v29  ;;  %3381 = vst [vmem:[#allocation7_spill] sm:$0xff] %v2867_v26 }
 0x1f2   :  { %2118 = vmatpush3.msra.mxu0 %v481_v29  ;;  %v2879_v29 = vld [vmem:[%s3352_s2 + $0x78] sm:$0xff] }
 0x1f3   :  { %2119 = vmatprep.subr.mxu0 %v480_v31  ;;  %3383 = vst [vmem:[#allocation9_spill] sm:$0xff] %v2879_v29 }
 0x1f4   :  { %2120 = vmatpush3.msra.mxu0 %v480_v31 }
 0x1f5   :  { %2121 = vmatprep.subr.mxu0 %v479_v33 }
 0x1f6   :  { %2122 = vmatpush3.msra.mxu0 %v479_v33 }
 0x1f7   :  { %2123 = vmatprep.subr.mxu0 %v478_v35 }
 0x1f8   :  { %2124 = vmatpush3.msra.mxu0 %v478_v35 }
 0x1f9   :  { %2125 = vmatprep.subr.mxu0 %v477_v37 }
 0x1fa   :  { %2126 = vmatpush3.msra.mxu0 %v477_v37 }
 0x1fb   :  { %2127 = vmatprep.subr.mxu0 %v476_v39 }
 0x1fc   :  { %2128 = vmatpush3.msra.mxu0 %v476_v39 }
 0x1fd   :  { %2129 = vmatprep.subr.mxu0 %v475_v41 }
 0x1fe   :  { %2130 = vmatpush3.msra.mxu0 %v475_v41 }
 0x1ff   :  { %2131 = vmatprep.subr.mxu0 %v474_v43 }
 0x200   :  { %2132 = vmatpush3.msra.mxu0 %v474_v43 }
 0x201   :  { %2133 = vmatprep.subr.mxu0 %v473_v45 }
 0x202   :  { %2134 = vmatpush3.msra.mxu0 %v473_v45 }
 0x203   :  { %2135 = vmatprep.subr.mxu0 %v472_v47 }
 0x204   :  { %2136 = vmatpush3.msra.mxu0 %v472_v47 }
 0x205   :  { %2137 = vmatprep.subr.mxu0 %v471_v49 }
 0x206   :  { %2138 = vmatpush3.msra.mxu0 %v471_v49 }
 0x207   :  { %2139 = vmatprep.subr.mxu0 %v470_v51 }
 0x208   :  { %2140 = vmatpush3.msra.mxu0 %v470_v51 }
 0x209   :  { %2141 = vmatprep.subr.mxu0 %v469_v53 }
 0x20a   :  { %2142 = vmatpush3.msra.mxu0 %v469_v53 }
 0x20b   :  { %2143 = vmatprep.subr.mxu0 %v468_v11 }
 0x20c   :  { %2144 = vmatpush3.msra.mxu0 %v468_v11 }
 0x20d   :  { %2145 = vmatprep.subr.mxu0 %v467_v14 }
 0x20e   :  { %2146 = vmatpush3.msra.mxu0 %v467_v14 }
 0x20f   :  { %2148 = vmatmul.mubr.f32.vlgmr.msra.gmra.mxu0 %v2795_v12 }
 0x210   :  { %2150 = vmatprep.mubr.f32.mxu0 %v2800_v15 }
 0x213   :  { %2151 = vmatmul.mubr.f32.gmra.mxu0 %v2807_v9 }
 0x214   :  { %2153 = vmatprep.mubr.f32.mxu0 %v2812_v10 }
 0x217   :  { %2154 = vmatmul.mubr.f32.gmra.mxu0 %v2819_v16 }
 0x218   :  { %2156 = vmatprep.mubr.f32.mxu0 %v2824_v17 }
 0x21b   :  { %2157 = vmatmul.mubr.f32.gmra.mxu0 %v2831_v18 }
 0x21c   :  { %2159 = vmatprep.mubr.f32.mxu0 %v2836_v19 }
 0x21f   :  { %2160 = vmatmul.mubr.f32.gmra.mxu0 %v2843_v20 }
 0x220   :  { %2162 = vmatprep.mubr.f32.mxu0 %v2848_v21 }
 0x223   :  { %2163 = vmatmul.mubr.f32.gmra.mxu0 %v2855_v22 }
 0x224   :  { %2165 = vmatprep.mubr.f32.mxu0 %v2860_v24 }
 0x227   :  { %2166 = vmatmul.mubr.f32.gmra.mxu0 %v2867_v26 }
 0x228   :  { %2168 = vmatprep.mubr.f32.mxu0 %v2872_v28 }
 0x22b   :  { %2169 = vmatmul.mubr.f32.gmra.mxu0 %v2879_v29 }
 0x22c   :  { %2259 = vmatprep.mubr.f32.mxu0 %v2681_v8 }
 0x2cf   :  { %v2149_v31 = vpop.f32.mrf.mxu0 }
 0x2d1   :  { %v549_v33 = vpop.f32.mrf.mxu0 }
 0x2d3   :  { %v2152_v35 = vpop.f32.mrf.mxu0 }
 0x2d5   :  { %v559_v37 = vpop.f32.mrf.mxu0 }
 0x2d7   :  { %v2155_v39 = vpop.f32.mrf.mxu0 }
 0x2d9   :  { %v569_v41 = vpop.f32.mrf.mxu0 }
 0x2db   :  { %v2158_v43 = vpop.f32.mrf.mxu0 }
 0x2dd   :  { %v579_v45 = vpop.f32.mrf.mxu0 }
 0x2df   :  { %v2161_v47 = vpop.f32.mrf.mxu0 }
 0x2e0   :  { %v637_v22 = vmax.f32 %v2161_v47, 0.0 }
 0x2e1   :  { %v589_v49 = vpop.f32.mrf.mxu0 }
 0x2e3   :  { %v2164_v51 = vpop.f32.mrf.mxu0 }
 0x2e4   :  { %v639_v26 = vmax.f32 %v2164_v51, 0.0  ;;  %v632_v51 = vmax.f32 %v569_v41, 0.0 }
 0x2e5   :  { %v599_v53 = vpop.f32.mrf.mxu0 }
 0x2e6   :  { %v638_v24 = vmax.f32 %v599_v53, 0.0 }
 0x2e7   :  { %v2167_v11 = vpop.f32.mrf.mxu0 }
 0x2e8   :  { %v641_v8 = vmax.f32 %v2167_v11, 0.0 }
 0x2e9   :  { %v609_v14 = vpop.f32.mrf.mxu0 }
 0x2ea   :  { %v640_v28 = vmax.f32 %v609_v14, 0.0 }
 0x2eb   :  { %v2170_v7 = vpop.f32.mrf.mxu0 }
 0x2ec   :  { %v643_v2 = vmax.f32 %v2170_v7, 0.0  ;;  %v636_v7 = vmax.f32 %v589_v49, 0.0 }
 0x2ed   :  { %v619_v5 = vpop.f32.mrf.mxu0 }
 0x2ee   :  { %v642_v29 = vmax.f32 %v619_v5, 0.0  ;;  %2171 = vmatprep.subr.mxu1 %v643_v2  ;;  %v635_v5 = vmax.f32 %v2158_v43, 0.0 }
 0x2ef   :  { %2172 = vmatpush3.msra.mxu1 %v643_v2  ;;  %v634_v2 = vmax.f32 %v579_v45, 0.0 }
 0x2f0   :  { %2173 = vmatprep.subr.mxu1 %v642_v29 }
 0x2f1   :  { %2174 = vmatpush3.msra.mxu1 %v642_v29  ;;  %v633_v29 = vmax.f32 %v2155_v39, 0.0 }
 0x2f2   :  { %2175 = vmatprep.subr.mxu1 %v641_v8 }
 0x2f3   :  { %2176 = vmatpush3.msra.mxu1 %v641_v8 }
 0x2f4   :  { %2177 = vmatprep.subr.mxu1 %v640_v28 }
 0x2f5   :  { %2178 = vmatpush3.msra.mxu1 %v640_v28  ;;  %v631_v28 = vmax.f32 %v2152_v35, 0.0 }
 0x2f6   :  { %2179 = vmatprep.subr.mxu1 %v639_v26 }
 0x2f7   :  { %2180 = vmatpush3.msra.mxu1 %v639_v26  ;;  %v630_v26 = vmax.f32 %v559_v37, 0.0 }
 0x2f8   :  { %2181 = vmatprep.subr.mxu1 %v638_v24 }
 0x2f9   :  { %2182 = vmatpush3.msra.mxu1 %v638_v24  ;;  %v629_v24 = vmax.f32 %v2149_v31, 0.0 }
 0x2fa   :  { %2183 = vmatprep.subr.mxu1 %v637_v22 }
 0x2fb   :  { %2184 = vmatpush3.msra.mxu1 %v637_v22  ;;  %v628_v22 = vmax.f32 %v549_v33, 0.0 }
 0x2fc   :  { %2185 = vmatprep.subr.mxu1 %v636_v7 }
 0x2fd   :  { %2186 = vmatpush3.msra.mxu1 %v636_v7 }
 0x2fe   :  { %2187 = vmatprep.subr.mxu1 %v635_v5 }
 0x2ff   :  { %2188 = vmatpush3.msra.mxu1 %v635_v5 }
 0x300   :  { %2189 = vmatprep.subr.mxu1 %v634_v2 }
 0x301   :  { %2190 = vmatpush3.msra.mxu1 %v634_v2  ;;  %v1235_v2 = vld [vmem:[%s3355_s10 + $0x18] sm:$0xff] }
 0x302   :  { %2191 = vmatprep.subr.mxu1 %v633_v29 }
 0x303   :  { %2192 = vmatpush3.msra.mxu1 %v633_v29  ;;  %v1234_v29 = vld [vmem:[%s3355_s10 + $0x10] sm:$0xff] }
 0x304   :  { %2193 = vmatprep.subr.mxu1 %v632_v51 }
 0x305   :  { %2194 = vmatpush3.msra.mxu1 %v632_v51  ;;  %v1233_v51 = vld [vmem:[%s3355_s10 + $0x8] sm:$0xff] }
 0x306   :  { %2195 = vmatprep.subr.mxu1 %v631_v28 }
 0x307   :  { %2196 = vmatpush3.msra.mxu1 %v631_v28  ;;  %v1232_v28 = vld [vmem:[%s3355_s10] sm:$0xff] }
 0x308   :  { %2197 = vmatprep.subr.mxu1 %v630_v26 }
 0x309   :  { %2198 = vmatpush3.msra.mxu1 %v630_v26  ;;  %v1459_v26 = vld [vmem:[%s3356_s12 + $0x38] sm:$0xff] }
 0x30a   :  { %2199 = vmatprep.subr.mxu1 %v629_v24 }
 0x30b   :  { %2200 = vmatpush3.msra.mxu1 %v629_v24  ;;  %v1458_v24 = vld [vmem:[%s3356_s12 + $0x30] sm:$0xff] }
 0x30c   :  { %2201 = vmatprep.subr.mxu1 %v628_v22 }
 0x30d   :  { %2202 = vmatpush3.msra.mxu1 %v628_v22  ;;  %v1457_v22 = vld [vmem:[%s3356_s12 + $0x28] sm:$0xff] }
 0x30e   :  { %2204 = vmatmul.mubr.f32.vlgmr.msra.gmra.mxu1 %v2590_v54  ;;  %v2901_v54 = vld [vmem:[%s3354_s6 + $0x18] sm:$0xff] }
 0x30f   :  { %2206 = vmatprep.mubr.f32.mxu1 %v2595_v55  ;;  %2387 = vmatprep.subr.mxu1 %v2901_v54  ;;  %v2907_v55 = vld [vmem:[%s3354_s6 + $0x10] sm:$0xff] }
 0x310   :  { %2391 = vmatpush3.msra.mxu1 %v2901_v54 }
 0x311   :  { %2388 = vmatprep.subr.mxu1 %v2907_v55 }
 0x312   :  { %2207 = vmatmul.mubr.f32.gmra.mxu1 %v2602_v56  ;;  %v2914_v56 = vld [vmem:[%s3354_s6 + $0x8] sm:$0xff] }
 0x313   :  { %2209 = vmatprep.mubr.f32.mxu1 %v2607_v57  ;;  %2392 = vmatpush3.msra.mxu1 %v2907_v55  ;;  %v2921_v57 = vld [vmem:[%s3354_s6] sm:$0xff] }
 0x314   :  { %2389 = vmatprep.subr.mxu1 %v2914_v56 }
 0x315   :  { %2393 = vmatpush3.msra.mxu1 %v2914_v56 }
 0x316   :  { %2210 = vmatmul.mubr.f32.gmra.mxu1 %v2614_v58  ;;  %2390 = vmatprep.subr.mxu1 %v2921_v57 }
 0x317   :  { %2212 = vmatprep.mubr.f32.mxu1 %v2619_v59  ;;  %2394 = vmatpush3.msra.mxu1 %v2921_v57 }
 0x318   :  { %2347 = vmatprep.subr.mxu1 %v1459_v26 }
 0x31a   :  { %2213 = vmatmul.mubr.f32.gmra.mxu1 %v2626_v60 }
 0x31b   :  { %2215 = vmatprep.mubr.f32.mxu1 %v2631_v61 }
 0x31e   :  { %2216 = vmatmul.mubr.f32.gmra.mxu1 %v2638_v62 }
 0x31f   :  { %2218 = vmatprep.mubr.f32.mxu1 %v2643_v63 }
 0x322   :  { %2219 = vmatmul.mubr.f32.gmra.mxu1 %v2650_v0 }
 0x323   :  { %2221 = vmatprep.mubr.f32.mxu1 %v2655_v1 }
 0x326   :  { %2222 = vmatmul.mubr.f32.gmra.mxu1 %v2662_v3 }
 0x327   :  { %2224 = vmatprep.mubr.f32.mxu1 %v2667_v4 }
 0x32a   :  { %2225 = vmatmul.mubr.f32.gmra.mxu1 %v2674_v6 }
 0x3ce   :  { %v2205_v58 = vpop.f32.mrf.mxu1 }
 0x3d0   :  { %v710_v59 = vpop.f32.mrf.mxu1 }
 0x3d2   :  { %v2208_v60 = vpop.f32.mrf.mxu1 }
 0x3d4   :  { %v720_v61 = vpop.f32.mrf.mxu1 }
 0x3d6   :  { %v2211_v62 = vpop.f32.mrf.mxu1 }
 0x3d8   :  { %v730_v63 = vpop.f32.mrf.mxu1 }
 0x3da   :  { %v2214_v0 = vpop.f32.mrf.mxu1 }
 0x3dc   :  { %v740_v1 = vpop.f32.mrf.mxu1 }
 0x3de   :  { %v2217_v3 = vpop.f32.mrf.mxu1 }
 0x3e0   :  { %v750_v4 = vpop.f32.mrf.mxu1 }
 0x3e2   :  { %v2220_v6 = vpop.f32.mrf.mxu1 }
 0x3e3   :  { %v800_v49 = vmul.f32 %v2220_v6, %v2718_v32  ;;  %v794_v32 = vmul.f32 %v2211_v62, %v2754_v44  ;;  %v3384_v44 = vld [vmem:[#allocation5_spill] sm:$0xff] }
 0x3e4   :  { %v760_v31 = vpop.f32.mrf.mxu1 }
 0x3e5   :  { %v799_v53 = vmul.f32 %v760_v31, %v2724_v34  ;;  %v793_v34 = vmul.f32 %v730_v63, %v2760_v46  ;;  %v3385_v46 = vld [vmem:[#allocation6_spill] sm:$0xff]  ;;  %v3389_v63 = vld [vmem:[#allocation3_spill] sm:$0xff] }
 0x3e6   :  { %v2223_v33 = vpop.f32.mrf.mxu1  ;;  %v3390_v31 = vld [vmem:[#allocation2_spill] sm:$0xff] }
 0x3e7   :  { %v802_v45 = vmul.f32 %v2223_v33, %v2706_v27  ;;  %v796_v27 = vmul.f32 %v2214_v0, %v2742_v40  ;;  %v790_v40 = vmul.f32 %v2205_v58, %v2779_v52  ;;  %v3388_v52 = vld [vmem:[#allocation9_spill] sm:$0xff] }
 0x3e8   :  { %v770_v35 = vpop.f32.mrf.mxu1 }
 0x3e9   :  { %v801_v47 = vmul.f32 %v770_v35, %v2712_v30  ;;  %v795_v30 = vmul.f32 %v740_v1, %v2748_v42  ;;  %v789_v42 = vmul.f32 %v710_v59, %v2786_v13  ;;  %v3019_v1 = vld [vmem:[%s3358_s8] ss:$0 sm:$0xff] }
 0x3ea   :  { %v2226_v37 = vpop.f32.mrf.mxu1 }
 0x3eb   :  { %v804_v39 = vmul.f32 %v2226_v37, %v2695_v23  ;;  %v798_v23 = vmul.f32 %v2217_v3, %v2730_v36  ;;  %v792_v36 = vmul.f32 %v2208_v60, %v2766_v48  ;;  %v3386_v48 = vld [vmem:[#allocation7_spill] sm:$0xff] }
 0x3ec   :  { %v780_v41 = vpop.f32.mrf.mxu1 }
 0x3ed   :  { %v803_v43 = vmul.f32 %v780_v41, %v2700_v25  ;;  %2227 = vmatprep.subr.mxu0 %v804_v39  ;;  %v797_v25 = vmul.f32 %v750_v4, %v2736_v38  ;;  %v791_v38 = vmul.f32 %v720_v61, %v2772_v50  ;;  %v3387_v50 = vld [vmem:[#allocation8_spill] sm:$0xff] }
 0x3ee   :  { %2228 = vmatpush3.msra.mxu0 %v804_v39 }
 0x3ef   :  { %2229 = vmatprep.subr.mxu0 %v803_v43 }
 0x3f0   :  { %2230 = vmatpush3.msra.mxu0 %v803_v43  ;;  %v3028_v43 = vld [vmem:[%s3359_s9] ss:$0 sm:$0xff] }
 0x3f1   :  { %2231 = vmatprep.subr.mxu0 %v802_v45 }
 0x3f2   :  { %2232 = vmatpush3.msra.mxu0 %v802_v45 }
 0x3f3   :  { %2233 = vmatprep.subr.mxu0 %v801_v47 }
 0x3f4   :  { %2234 = vmatpush3.msra.mxu0 %v801_v47  ;;  %v3391_v47 = vld [vmem:[#allocation4_spill] sm:$0xff] }
 0x3f5   :  { %2235 = vmatprep.subr.mxu0 %v800_v49 }
 0x3f6   :  { %2236 = vmatpush3.msra.mxu0 %v800_v49 }
 0x3f7   :  { %2237 = vmatprep.subr.mxu0 %v799_v53 }
 0x3f8   :  { %2238 = vmatpush3.msra.mxu0 %v799_v53 }
 0x3f9   :  { %2239 = vmatprep.subr.mxu0 %v798_v23 }
 0x3fa   :  { %2240 = vmatpush3.msra.mxu0 %v798_v23 }
 0x3fb   :  { %2241 = vmatprep.subr.mxu0 %v797_v25 }
 0x3fc   :  { %2242 = vmatpush3.msra.mxu0 %v797_v25 }
 0x3fd   :  { %2243 = vmatprep.subr.mxu0 %v796_v27 }
 0x3fe   :  { %2244 = vmatpush3.msra.mxu0 %v796_v27 }
 0x3ff   :  { %2245 = vmatprep.subr.mxu0 %v795_v30 }
 0x400   :  { %2246 = vmatpush3.msra.mxu0 %v795_v30  ;;  %v2395_v30 = vld [vmem:[%s3349_s0 + $0x10] sm:$0xff] }
 0x401   :  { %2247 = vmatprep.subr.mxu0 %v794_v32 }
 0x402   :  { %2248 = vmatpush3.msra.mxu0 %v794_v32 }
 0x403   :  { %2249 = vmatprep.subr.mxu0 %v793_v34 }
 0x404   :  { %2250 = vmatpush3.msra.mxu0 %v793_v34 }
 0x405   :  { %2251 = vmatprep.subr.mxu0 %v792_v36 }
 0x406   :  { %2252 = vmatpush3.msra.mxu0 %v792_v36 }
 0x407   :  { %2253 = vmatprep.subr.mxu0 %v791_v38 }
 0x408   :  { %2254 = vmatpush3.msra.mxu0 %v791_v38 }
 0x409   :  { %2255 = vmatprep.subr.mxu0 %v790_v40 }
 0x40a   :  { %2256 = vmatpush3.msra.mxu0 %v790_v40 }
 0x40b   :  { %2257 = vmatprep.subr.mxu0 %v789_v42 }
 0x40c   :  { %2258 = vmatpush3.msra.mxu0 %v789_v42 }
 0x40d   :  { %2260 = vmatmul.mubr.f32.vlgmr.msra.gmra.mxu0 %v2795_v12  ;;  %2283 = vmatprep.subr.mxu0 %v2901_v54 }
 0x40e   :  { %2262 = vmatprep.mubr.f32.mxu0 %v2800_v15  ;;  %2284 = vmatpush3.msra.mxu0 %v2901_v54  ;;  %v1456_v54 = vld [vmem:[%s3356_s12 + $0x20] sm:$0xff] }
 0x40f   :  { %2285 = vmatprep.subr.mxu0 %v2907_v55 }
 0x410   :  { %2286 = vmatpush3.msra.mxu0 %v2907_v55  ;;  %v1455_v55 = vld [vmem:[%s3356_s12 + $0x18] sm:$0xff] }
 0x411   :  { %2263 = vmatmul.mubr.f32.gmra.mxu0 %v2807_v9  ;;  %2287 = vmatprep.subr.mxu0 %v2914_v56 }
 0x412   :  { %2265 = vmatprep.mubr.f32.mxu0 %v2812_v10  ;;  %2288 = vmatpush3.msra.mxu0 %v2914_v56  ;;  %v3011_v56 = vld [vmem:[%s3357_s7] ss:$0 sm:$0xff] }
 0x413   :  { %2289 = vmatprep.subr.mxu0 %v2921_v57 }
 0x414   :  { %2290 = vmatpush3.msra.mxu0 %v2921_v57 }
 0x415   :  { %2266 = vmatmul.mubr.f32.gmra.mxu0 %v2819_v16  ;;  %2315 = vmatprep.subr.mxu0 %v1235_v2 }
 0x416   :  { %2268 = vmatprep.mubr.f32.mxu0 %v2824_v17 }
 0x419   :  { %2269 = vmatmul.mubr.f32.gmra.mxu0 %v2831_v18 }
 0x41a   :  { %2271 = vmatprep.mubr.f32.mxu0 %v2836_v19 }
 0x41d   :  { %2272 = vmatmul.mubr.f32.gmra.mxu0 %v2843_v20 }
 0x41e   :  { %2274 = vmatprep.mubr.f32.mxu0 %v2848_v21 }
 0x421   :  { %2275 = vmatmul.mubr.f32.gmra.mxu0 %v3384_v44 }
 0x422   :  { %2277 = vmatprep.mubr.f32.mxu0 %v3385_v46 }
 0x425   :  { %2278 = vmatmul.mubr.f32.gmra.mxu0 %v3386_v48 }
 0x426   :  { %2280 = vmatprep.mubr.f32.mxu0 %v3387_v50  ;;  %v2396_v50 = vld [vmem:[%s3349_s0 + $0x28] sm:$0xff] }
 0x429   :  { %2281 = vmatmul.mubr.f32.gmra.mxu0 %v3388_v52 }
 0x4cd   :  { %v2261_v13 = vpop.f32.mrf.mxu0 }
 0x4cf   :  { %v871_v12 = vpop.f32.mrf.mxu0 }
 0x4d0   :  { %2291 = vmatprep.mubr.msk.f32.mxu0 %vm128_vm0, %v871_v12 }
 0x4d1   :  { %v2264_v15 = vpop.f32.mrf.mxu0  ;;  %2292 = vmatmul.mubr.msk.f32.vlgmr.msra.gmra.mxu0 %vm128_vm0, %v2261_v13 }
 0x4d2   :  { %2316 = vmatpush3.msra.mxu0 %v1235_v2  ;;  %v2399_v2 = vld [vmem:[%s3349_s0 + $0x30] sm:$0xff] }
 0x4d3   :  { %v881_v9 = vpop.f32.mrf.mxu0  ;;  %2317 = vmatprep.subr.mxu0 %v1234_v29 }
 0x4d4   :  { %2294 = vmatprep.mubr.msk.f32.mxu0 %vm128_vm0, %v881_v9  ;;  %2318 = vmatpush3.msra.mxu0 %v1234_v29 }
 0x4d5   :  { %v2267_v10 = vpop.f32.mrf.mxu0  ;;  %2295 = vmatmul.mubr.msk.f32.gmra.mxu0 %vm128_vm0, %v2264_v15  ;;  %2319 = vmatprep.subr.mxu0 %v1233_v51  ;;  %v2397_v15 = vld [vmem:[%s3349_s0 + $0x20] sm:$0xff] }
 0x4d6   :  { %2320 = vmatpush3.msra.mxu0 %v1233_v51 }
 0x4d7   :  { %v891_v16 = vpop.f32.mrf.mxu0  ;;  %2321 = vmatprep.subr.mxu0 %v1232_v28 }
 0x4d8   :  { %2297 = vmatprep.mubr.msk.f32.mxu0 %vm128_vm0, %v891_v16  ;;  %2322 = vmatpush3.msra.mxu0 %v1232_v28 }
 0x4d9   :  { %v2270_v17 = vpop.f32.mrf.mxu0  ;;  %2298 = vmatmul.mubr.msk.f32.gmra.mxu0 %vm128_vm0, %v2267_v10 }
 0x4db   :  { %v901_v18 = vpop.f32.mrf.mxu0 }
 0x4dc   :  { %2300 = vmatprep.mubr.msk.f32.mxu1 %vm128_vm0, %v901_v18 }
 0x4dd   :  { %v2273_v19 = vpop.f32.mrf.mxu0  ;;  %2301 = vmatmul.mubr.msk.f32.vlgmr.msra.gmra.mxu1 %vm128_vm0, %v2270_v17 }
 0x4de   :  { %2348 = vmatpush3.msra.mxu1 %v1459_v26 }
 0x4df   :  { %v911_v20 = vpop.f32.mrf.mxu0  ;;  %2349 = vmatprep.subr.mxu1 %v1458_v24 }
 0x4e0   :  { %2303 = vmatprep.mubr.msk.f32.mxu1 %vm128_vm0, %v911_v20  ;;  %2350 = vmatpush3.msra.mxu1 %v1458_v24 }
 0x4e1   :  { %v2276_v21 = vpop.f32.mrf.mxu0  ;;  %2304 = vmatmul.mubr.msk.f32.gmra.mxu1 %vm128_vm0, %v2273_v19  ;;  %2351 = vmatprep.subr.mxu1 %v1457_v22 }
 0x4e2   :  { %2352 = vmatpush3.msra.mxu1 %v1457_v22 }
 0x4e3   :  { %v921_v11 = vpop.f32.mrf.mxu0  ;;  %2353 = vmatprep.subr.mxu1 %v1456_v54 }
 0x4e4   :  { %2306 = vmatprep.mubr.msk.f32.mxu1 %vm128_vm0, %v921_v11  ;;  %2354 = vmatpush3.msra.mxu1 %v1456_v54 }
 0x4e5   :  { %v2279_v14 = vpop.f32.mrf.mxu0  ;;  %2307 = vmatmul.mubr.msk.f32.gmra.mxu1 %vm128_vm0, %v2276_v21  ;;  %2355 = vmatprep.subr.mxu1 %v1455_v55  ;;  %v2398_v21 = vld [vmem:[%s3349_s0 + $0x38] sm:$0xff] }
 0x4e6   :  { %2356 = vmatpush3.msra.mxu1 %v1455_v55  ;;  %v2400_v55 = vld [vmem:[%s3349_s0 + $0x48] sm:$0xff] }
 0x4e7   :  { %v931_v8 = vpop.f32.mrf.mxu0 }
 0x4e8   :  { %2309 = vmatprep.mubr.msk.f32.mxu1 %vm128_vm0, %v931_v8 }
 0x4e9   :  { %v2282_v7 = vpop.f32.mrf.mxu0  ;;  %2310 = vmatmul.mubr.msk.f32.gmra.mxu1 %vm128_vm0, %v2279_v14 }
 0x4eb   :  { %v941_v5 = vpop.f32.mrf.mxu0 }
 0x4ec   :  { %2312 = vmatprep.mubr.msk.f32.mxu1 %vm128_vm0, %v941_v5 }
 0x4ed   :  { %2313 = vmatmul.mubr.msk.f32.gmra.mxu1 %vm128_vm0, %v2282_v7 }
 0x591   :  { %v2293_v57 = vpop.f32.mrf.mxu0 }
 0x592   :  { %v1081_v58 = vadd.f32 %v2293_v57, %v3011_v56 }
 0x593   :  { %v1075_v59 = vpop.f32.mrf.mxu0 }
 0x594   :  { %v1155_v60 = vmax.f32 %v1081_v58, 0.0  ;;  %v1076_v61 = vadd.f32 %v3011_v56, %v1075_v59 }
 0x595   :  { %v2296_v62 = vpop.f32.mrf.mxu0 }
 0x596   :  { %v1171_v0 = vadd.f32 %v1155_v60, %v3389_v63  ;;  %v1154_v3 = vmax.f32 %v1076_v61, 0.0  ;;  %v1091_v4 = vadd.f32 %v2296_v62, %v3011_v56 }
 0x597   :  { %v1085_v6 = vpop.f32.mrf.mxu0 }
 0x598   :  { %v1170_v33 = vadd.f32 %v1154_v3, %v3390_v31  ;;  %v1157_v35 = vmax.f32 %v1091_v4, 0.0  ;;  %v1086_v37 = vadd.f32 %v3011_v56, %v1085_v6  ;;  %v1194_v39 = vmul.f32 %v3019_v1, %v1171_v0  ;;  %v2401_v4 = vld [vmem:[%s3349_s0 + $0x40] sm:$0xff] }
 0x599   :  { %v2299_v41 = vpop.f32.mrf.mxu0 }
 0x59a   :  { %v1193_v45 = vmul.f32 %v3019_v1, %v1170_v33  ;;  %v1173_v49 = vadd.f32 %v1157_v35, %v3391_v47  ;;  %v1156_v53 = vmax.f32 %v1086_v37, 0.0  ;;  %v1101_v23 = vadd.f32 %v2299_v41, %v3011_v56  ;;  %v2402_v33 = vld [vmem:[%s3349_s0 + $0x58] sm:$0xff]  ;;  %v2403_v47 = vld [vmem:[%s3349_s0 + $0x50] sm:$0xff] }
 0x59b   :  { %v1095_v25 = vpop.f32.mrf.mxu0  ;;  %v3041_v36 = vadd.f32 %v3028_v43, %v1194_v39 }
 0x59c   :  { %v3034_v27 = vadd.f32 %v3028_v43, %v1193_v45  ;;  %v1172_v32 = vadd.f32 %v2395_v30, %v1156_v53  ;;  %v1096_v34 = vadd.f32 %v3011_v56, %v1095_v25  ;;  %v1196_v38 = vmul.f32 %v3019_v1, %v1173_v49 }
 0x59d   :  { %v1159_v40 = vmax.f32 %v1101_v23, 0.0  ;;  %v2302_v42 = vpop.f32.mrf.mxu1 }
 0x59e   :  { %v1195_v44 = vmul.f32 %v3019_v1, %v1172_v32  ;;  %v1158_v46 = vmax.f32 %v1096_v34, 0.0  ;;  %v1111_v48 = vadd.f32 %v2302_v42, %v3011_v56  ;;  %2323 = vmatprep.mubr.msk.f32.mxu0 %vm128_vm0, %v3034_v27  ;;  %v3061_v17 = vadd.f32 %v3028_v43, %v1196_v38 }
 0x59f   :  { %v1175_v52 = vadd.f32 %v2396_v50, %v1159_v40  ;;  %v1105_v13 = vpop.f32.mrf.mxu1  ;;  %2324 = vmatmul.mubr.msk.f32.vlgmr.msra.gmra.mxu0 %vm128_vm0, %v3041_v36  ;;  %v2404_v40 = vld [vmem:[%s3349_s0 + $0x68] sm:$0xff] }
 0x5a0   :  { %v3054_v12 = vadd.f32 %v3028_v43, %v1195_v44  ;;  %v1174_v9 = vadd.f32 %v2397_v15, %v1158_v46  ;;  %v1161_v10 = vmax.f32 %v1111_v48, 0.0  ;;  %v1106_v16 = vadd.f32 %v3011_v56, %v1105_v13 }
 0x5a1   :  { %v1198_v18 = vmul.f32 %v3019_v1, %v1175_v52  ;;  %v2305_v19 = vpop.f32.mrf.mxu1  ;;  %v2405_v52 = vld [vmem:[%s3349_s0 + $0x60] sm:$0xff] }
 0x5a2   :  { %v1197_v20 = vmul.f32 %v3019_v1, %v1174_v9  ;;  %v1177_v11 = vadd.f32 %v2398_v21, %v1161_v10  ;;  %v1160_v14 = vmax.f32 %v1106_v16, 0.0  ;;  %v1121_v8 = vadd.f32 %v2305_v19, %v3011_v56  ;;  %2326 = vmatprep.mubr.msk.f32.mxu0 %vm128_vm0, %v3054_v12 }
 0x5a3   :  { %v1115_v7 = vpop.f32.mrf.mxu1  ;;  %2327 = vmatmul.mubr.msk.f32.gmra.mxu0 %vm128_vm0, %v3061_v17  ;;  %v3080_v28 = vadd.f32 %v3028_v43, %v1198_v18 }
 0x5a4   :  { %v3074_v5 = vadd.f32 %v3028_v43, %v1197_v20  ;;  %v1176_v29 = vadd.f32 %v2399_v2, %v1160_v14  ;;  %v1163_v51 = vmax.f32 %v1121_v8, 0.0  ;;  %v1200_v26 = vmul.f32 %v3019_v1, %v1177_v11  ;;  %v2406_v20 = vld [vmem:[%s3349_s0 + $0x78] sm:$0xff]  ;;  %v2407_v11 = vld [vmem:[%s3349_s0 + $0x70] sm:$0xff] }
 0x5a5   :  { %v1116_v24 = vadd.f32 %v3011_v56, %v1115_v7  ;;  %v2308_v22 = vpop.f32.mrf.mxu1 }
 0x5a6   :  { %v1199_v54 = vmul.f32 %v3019_v1, %v1176_v29  ;;  %v1179_v57 = vadd.f32 %v2400_v55, %v1163_v51  ;;  %v1131_v58 = vadd.f32 %v2308_v22, %v3011_v56  ;;  %2329 = vmatprep.mubr.msk.f32.mxu0 %vm128_vm0, %v3074_v5  ;;  %v3098_v0 = vadd.f32 %v3028_v43, %v1200_v26  ;;  %v1453_v26 = vld [vmem:[%s3356_s12 + $0x8] sm:$0xff] }
 0x5a7   :  { %v1162_v59 = vmax.f32 %v1116_v24, 0.0  ;;  %v1125_v60 = vpop.f32.mrf.mxu1  ;;  %2330 = vmatmul.mubr.msk.f32.gmra.mxu0 %vm128_vm0, %v3080_v28  ;;  %v1779_v24 = vld [vmem:[%s3360_s11] ss:$0 sm:$0xff] }
 0x5a8   :  { %v3094_v61 = vadd.f32 %v3028_v43, %v1199_v54  ;;  %v1165_v62 = vmax.f32 %v1131_v58, 0.0  ;;  %v1126_v63 = vadd.f32 %v3011_v56, %v1125_v60  ;;  %v1202_v3 = vmul.f32 %v3019_v1, %v1179_v57 }
 0x5a9   :  { %v1178_v6 = vadd.f32 %v2401_v4, %v1162_v59  ;;  %v2311_v31 = vpop.f32.mrf.mxu1 }
 0x5aa   :  { %v1181_v35 = vadd.f32 %v2402_v33, %v1165_v62  ;;  %v1164_v37 = vmax.f32 %v1126_v63, 0.0  ;;  %v1141_v39 = vadd.f32 %v2311_v31, %v3011_v56  ;;  %2332 = vmatprep.mubr.msk.f32.mxu0 %vm128_vm0, %v3094_v61  ;;  %v3118_v25 = vadd.f32 %v3028_v43, %v1202_v3 }
 0x5ab   :  { %v1201_v41 = vmul.f32 %v3019_v1, %v1178_v6  ;;  %v1135_v45 = vpop.f32.mrf.mxu1  ;;  %2333 = vmatmul.mubr.msk.f32.gmra.mxu0 %vm128_vm0, %v3098_v0 }
 0x5ac   :  { %v1180_v49 = vadd.f32 %v2403_v47, %v1164_v37  ;;  %v1167_v53 = vmax.f32 %v1141_v39, 0.0  ;;  %v1136_v23 = vadd.f32 %v3011_v56, %v1135_v45  ;;  %v1204_v34 = vmul.f32 %v3019_v1, %v1181_v35 }
 0x5ad   :  { %v3121_v30 = vadd.f32 %v3028_v43, %v1201_v41  ;;  %v2314_v32 = vpop.f32.mrf.mxu1 }
 0x5ae   :  { %v1203_v38 = vmul.f32 %v3019_v1, %v1180_v49  ;;  %v1183_v42 = vadd.f32 %v2404_v40, %v1167_v53  ;;  %v1166_v44 = vmax.f32 %v1136_v23, 0.0  ;;  %v1151_v46 = vadd.f32 %v2314_v32, %v3011_v56 }
 0x5af   :  { %2335 = vmatprep.mubr.msk.f32.mxu0 %vm128_vm0, %v3121_v30  ;;  %v1145_v48 = vpop.f32.mrf.mxu1  ;;  %v3141_v10 = vadd.f32 %v3028_v43, %v1204_v34 }
 0x5b0   :  { %v3132_v50 = vadd.f32 %v3028_v43, %v1203_v38  ;;  %v1182_v13 = vadd.f32 %v2405_v52, %v1166_v44  ;;  %v1146_v15 = vadd.f32 %v3011_v56, %v1145_v48  ;;  %2336 = vmatmul.mubr.msk.f32.gmra.mxu0 %vm128_vm0, %v3118_v25  ;;  %v1169_v9 = vmax.f32 %v1151_v46, 0.0 }
 0x5b1   :  { %v1206_v16 = vmul.f32 %v3019_v1, %v1183_v42 }
 0x5b2   :  { %v1205_v18 = vmul.f32 %v3019_v1, %v1182_v13  ;;  %v1168_v19 = vmax.f32 %v1146_v15, 0.0  ;;  %2338 = vmatprep.mubr.msk.f32.mxu0 %vm128_vm0, %v3132_v50  ;;  %v1185_v56 = vadd.f32 %v2406_v20, %v1169_v9 }
 0x5b3   :  { %v3159_v8 = vadd.f32 %v3028_v43, %v1206_v16 }
 0x5b4   :  { %v3151_v21 = vadd.f32 %v3028_v43, %v1205_v18  ;;  %v1184_v14 = vadd.f32 %v2407_v11, %v1168_v19  ;;  %2339 = vmatmul.mubr.msk.f32.gmra.mxu0 %vm128_vm0, %v3141_v10  ;;  %v1208_v7 = vmul.f32 %v3019_v1, %v1185_v56 }
 0x5b6   :  { %v1207_v2 = vmul.f32 %v3019_v1, %v1184_v14  ;;  %2341 = vmatprep.mubr.msk.f32.mxu0 %vm128_vm0, %v3151_v21  ;;  %v3171_v51 = vadd.f32 %v3028_v43, %v1208_v7  ;;  %v1454_v1 = vld [vmem:[%s3356_s12 + $0x10] sm:$0xff] }
 0x5b7   :  { %2357 = vmatprep.subr.mxu1 %v1454_v1 }
 0x5b8   :  { %v3166_v29 = vadd.f32 %v3028_v43, %v1207_v2  ;;  %2342 = vmatmul.mubr.msk.f32.gmra.mxu0 %vm128_vm0, %v3159_v8  ;;  %2358 = vmatpush3.msra.mxu1 %v1454_v1  ;;  %v1452_v43 = vld [vmem:[%s3356_s12] sm:$0xff] }
 0x5b9   :  { %2359 = vmatprep.subr.mxu1 %v1453_v26 }
 0x5ba   :  { %2344 = vmatprep.mubr.msk.f32.mxu0 %vm128_vm0, %v3166_v29  ;;  %2360 = vmatpush3.msra.mxu1 %v1453_v26 }
 0x5bb   :  { %2361 = vmatprep.subr.mxu1 %v1452_v43 }
 0x5bc   :  { %2345 = vmatmul.mubr.msk.f32.gmra.mxu0 %vm128_vm0, %v3171_v51  ;;  %2362 = vmatpush3.msra.mxu1 %v1452_v43 }
 0x65f   :  { %v2325_v22 = vpop.f32.mrf.mxu0 }
 0x660   :  { %v1363_v54 = vadd.f32 %v2325_v22, %v1779_v24 }
 0x661   :  { %v1357_v55 = vpop.f32.mrf.mxu0 }
 0x662   :  { %v1358_v57 = vadd.f32 %v1779_v24, %v1357_v55  ;;  %v1437_v60 = vmax.f32 %v1363_v54, 0.0  ;;  %v3208_v54 = vld [vmem:[%s3361_s13] ss:$0 sm:$0xff] }
 0x663   :  { %v2328_v58 = vpop.f32.mrf.mxu0 }
 0x664   :  { %v1436_v59 = vmax.f32 %v1358_v57, 0.0  ;;  %v1373_v62 = vadd.f32 %v2328_v58, %v1779_v24 }
 0x665   :  { %v1367_v63 = vpop.f32.mrf.mxu0 }
 0x666   :  { %v1368_v3 = vadd.f32 %v1779_v24, %v1367_v63  ;;  %2363 = vmatprep.mubr.msk.f32.mxu1 %vm1467_vm1, %v1436_v59  ;;  %v1439_v31 = vmax.f32 %v1373_v62, 0.0  ;;  %v3221_v62 = vld [vmem:[%s3363_s15] ss:$0 sm:$0xff] }
 0x667   :  { %v2331_v4 = vpop.f32.mrf.mxu0  ;;  %2364 = vmatmul.mubr.msk.f32.vlgmr.msra.gmra.mxu1 %vm1467_vm1, %v1437_v60 }
 0x668   :  { %v1438_v6 = vmax.f32 %v1368_v3, 0.0  ;;  %v1383_v33 = vadd.f32 %v2331_v4, %v1779_v24 }
 0x669   :  { %v1377_v35 = vpop.f32.mrf.mxu0 }
 0x66a   :  { %v1378_v37 = vadd.f32 %v1779_v24, %v1377_v35  ;;  %2366 = vmatprep.mubr.msk.f32.mxu1 %vm1467_vm1, %v1438_v6  ;;  %v1441_v45 = vmax.f32 %v1383_v33, 0.0 }
 0x66b   :  { %v2334_v39 = vpop.f32.mrf.mxu0  ;;  %2367 = vmatmul.mubr.msk.f32.gmra.mxu1 %vm1467_vm1, %v1439_v31 }
 0x66c   :  { %v1440_v41 = vmax.f32 %v1378_v37, 0.0  ;;  %v1393_v47 = vadd.f32 %v2334_v39, %v1779_v24 }
 0x66d   :  { %v1387_v49 = vpop.f32.mrf.mxu0 }
 0x66e   :  { %v1388_v53 = vadd.f32 %v1779_v24, %v1387_v49  ;;  %2369 = vmatprep.mubr.msk.f32.mxu1 %vm1467_vm1, %v1440_v41  ;;  %v1443_v34 = vmax.f32 %v1393_v47, 0.0 }
 0x66f   :  { %2370 = vmatmul.mubr.msk.f32.gmra.mxu1 %vm1467_vm1, %v1441_v45 }
 0x670   :  { %v1442_v23 = vmax.f32 %v1388_v53, 0.0  ;;  %v2337_v32 = vpop.f32.mrf.mxu0 }
 0x671   :  { %v1403_v38 = vadd.f32 %v2337_v32, %v1779_v24 }
 0x672   :  { %v1397_v40 = vpop.f32.mrf.mxu0  ;;  %2372 = vmatprep.mubr.msk.f32.mxu1 %vm1467_vm1, %v1442_v23 }
 0x673   :  { %v1398_v42 = vadd.f32 %v1779_v24, %v1397_v40  ;;  %2373 = vmatmul.mubr.msk.f32.gmra.mxu1 %vm1467_vm1, %v1443_v34  ;;  %v1445_v48 = vmax.f32 %v1403_v38, 0.0 }
 0x674   :  { %v2340_v44 = vpop.f32.mrf.mxu0 }
 0x675   :  { %v1444_v46 = vmax.f32 %v1398_v42, 0.0  ;;  %v1413_v52 = vadd.f32 %v2340_v44, %v1779_v24 }
 0x676   :  { %v1407_v13 = vpop.f32.mrf.mxu0 }
 0x677   :  { %v1408_v15 = vadd.f32 %v1779_v24, %v1407_v13  ;;  %2375 = vmatprep.mubr.msk.f32.mxu1 %vm1467_vm1, %v1444_v46  ;;  %v1447_v18 = vmax.f32 %v1413_v52, 0.0 }
 0x678   :  { %v2343_v9 = vpop.f32.mrf.mxu0  ;;  %2376 = vmatmul.mubr.msk.f32.gmra.mxu1 %vm1467_vm1, %v1445_v48 }
 0x679   :  { %v1446_v16 = vmax.f32 %v1408_v15, 0.0  ;;  %v1423_v19 = vadd.f32 %v2343_v9, %v1779_v24 }
 0x67a   :  { %v1417_v20 = vpop.f32.mrf.mxu0 }
 0x67b   :  { %v1418_v56 = vadd.f32 %v1779_v24, %v1417_v20  ;;  %2378 = vmatprep.mubr.msk.f32.mxu1 %vm1467_vm1, %v1446_v16  ;;  %v1449_v7 = vmax.f32 %v1423_v19, 0.0 }
 0x67c   :  { %v2346_v11 = vpop.f32.mrf.mxu0  ;;  %2379 = vmatmul.mubr.msk.f32.gmra.mxu1 %vm1467_vm1, %v1447_v18 }
 0x67d   :  { %v1448_v14 = vmax.f32 %v1418_v56, 0.0  ;;  %v1433_v2 = vadd.f32 %v2346_v11, %v1779_v24 }
 0x67e   :  { %v1427_v1 = vpop.f32.mrf.mxu0 }
 0x67f   :  { %v1428_v26 = vadd.f32 %v1779_v24, %v1427_v1  ;;  %2381 = vmatprep.mubr.msk.f32.mxu1 %vm1467_vm1, %v1448_v14  ;;  %v1451_v22 = vmax.f32 %v1433_v2, 0.0  ;;  %v3214_v24 = vld [vmem:[%s3362_s14] ss:$0 sm:$0xff] }
 0x680   :  { %2382 = vmatmul.mubr.msk.f32.gmra.mxu1 %vm1467_vm1, %v1449_v7 }
 0x681   :  { %v1450_v43 = vmax.f32 %v1428_v26, 0.0 }
 0x683   :  { %2384 = vmatprep.mubr.msk.f32.mxu1 %vm1467_vm1, %v1450_v43 }
 0x684   :  { %2385 = vmatmul.mubr.msk.f32.gmra.mxu1 %vm1467_vm1, %v1451_v22 }
 0x727   :  { %v2365_v55 = vpop.f32.mrf.mxu1 }
 0x728   :  { %v1588_v57 = vadd.f32 %v2365_v55, %v3208_v54 }
 0x729   :  { %v1582_v58 = vpop.f32.mrf.mxu1 }
 0x72a   :  { %v1662_v59 = vadd.f32 %v1588_v57, %v3041_v36  ;;  %v1583_v60 = vadd.f32 %v3208_v54, %v1582_v58 }
 0x72b   :  { %v2368_v63 = vpop.f32.mrf.mxu1 }
 0x72c   :  { %v1685_v3 = vmul.f32 %v3214_v24, %v1662_v59  ;;  %v1661_v4 = vadd.f32 %v1583_v60, %v3034_v27  ;;  %v1598_v6 = vadd.f32 %v2368_v63, %v3208_v54 }
 0x72d   :  { %v1592_v31 = vpop.f32.mrf.mxu1 }
 0x72e   :  { %v1708_v33 = vadd.f32 %v3221_v62, %v1685_v3  ;;  %v1684_v35 = vmul.f32 %v3214_v24, %v1661_v4  ;;  %v1664_v36 = vadd.f32 %v1598_v6, %v3061_v17  ;;  %v1593_v37 = vadd.f32 %v3208_v54, %v1592_v31 }
 0x72f   :  { %v2371_v39 = vpop.f32.mrf.mxu1 }
 0x730   :  { %1724 = vst.msk [vmem:[%s3364_s16 + $0x8] sm:$0xff] %vm128_vm0, %v1708_v33  ;;  %v1707_v41 = vadd.f32 %v3221_v62, %v1684_v35  ;;  %v1687_v27 = vmul.f32 %v3214_v24, %v1664_v36  ;;  %v1663_v45 = vadd.f32 %v1593_v37, %v3054_v12  ;;  %v1608_v47 = vadd.f32 %v2371_v39, %v3208_v54 }
 0x731   :  { %v1602_v49 = vpop.f32.mrf.mxu1 }
 0x732   :  { %1723 = vst.msk [vmem:[%s3364_s16] sm:$0xff] %vm128_vm0, %v1707_v41  ;;  %v1710_v17 = vadd.f32 %v3221_v62, %v1687_v27  ;;  %v1686_v53 = vmul.f32 %v3214_v24, %v1663_v45  ;;  %v1666_v23 = vadd.f32 %v1608_v47, %v3080_v28  ;;  %v1603_v32 = vadd.f32 %v3208_v54, %v1602_v49 }
 0x733   :  { %v2374_v34 = vpop.f32.mrf.mxu1 }
 0x734   :  { %1726 = vst.msk [vmem:[%s3364_s16 + $0x18] sm:$0xff] %vm128_vm0, %v1710_v17  ;;  %v1709_v12 = vadd.f32 %v3221_v62, %v1686_v53  ;;  %v1689_v38 = vmul.f32 %v3214_v24, %v1666_v23  ;;  %v1665_v40 = vadd.f32 %v1603_v32, %v3074_v5  ;;  %v1618_v42 = vadd.f32 %v2374_v34, %v3208_v54 }
 0x735   :  { %v1612_v44 = vpop.f32.mrf.mxu1 }
 0x736   :  { %1725 = vst.msk [vmem:[%s3364_s16 + $0x10] sm:$0xff] %vm128_vm0, %v1709_v12  ;;  %v1712_v28 = vadd.f32 %v3221_v62, %v1689_v38  ;;  %v1688_v46 = vmul.f32 %v3214_v24, %v1665_v40  ;;  %v1668_v48 = vadd.f32 %v1618_v42, %v3098_v0  ;;  %v1613_v52 = vadd.f32 %v3208_v54, %v1612_v44 }
 0x738   :  { %1728 = vst.msk [vmem:[%s3364_s16 + $0x28] sm:$0xff] %vm128_vm0, %v1712_v28  ;;  %v1711_v5 = vadd.f32 %v3221_v62, %v1688_v46  ;;  %v1691_v13 = vmul.f32 %v3214_v24, %v1668_v48  ;;  %v1667_v15 = vadd.f32 %v1613_v52, %v3094_v61  ;;  %v2377_v9 = vpop.f32.mrf.mxu1 }
 0x739   :  { %v1628_v16 = vadd.f32 %v2377_v9, %v3208_v54 }
 0x73a   :  { %1727 = vst.msk [vmem:[%s3364_s16 + $0x20] sm:$0xff] %vm128_vm0, %v1711_v5  ;;  %v1714_v0 = vadd.f32 %v3221_v62, %v1691_v13  ;;  %v1690_v18 = vmul.f32 %v3214_v24, %v1667_v15  ;;  %v1622_v19 = vpop.f32.mrf.mxu1 }
 0x73b   :  { %v1670_v20 = vadd.f32 %v1628_v16, %v3118_v25  ;;  %v1623_v56 = vadd.f32 %v3208_v54, %v1622_v19 }
 0x73c   :  { %1730 = vst.msk [vmem:[%s3364_s16 + $0x38] sm:$0xff] %vm128_vm0, %v1714_v0  ;;  %v1713_v61 = vadd.f32 %v3221_v62, %v1690_v18  ;;  %v2380_v11 = vpop.f32.mrf.mxu1 }
 0x73d   :  { %v1693_v14 = vmul.f32 %v3214_v24, %v1670_v20  ;;  %v1669_v7 = vadd.f32 %v1623_v56, %v3121_v30  ;;  %v1638_v2 = vadd.f32 %v2380_v11, %v3208_v54 }
 0x73e   :  { %1729 = vst.msk [vmem:[%s3364_s16 + $0x30] sm:$0xff] %vm128_vm0, %v1713_v61  ;;  %v1632_v25 = vpop.f32.mrf.mxu1 }
 0x73f   :  { %v1716_v1 = vadd.f32 %v3221_v62, %v1693_v14  ;;  %v1692_v26 = vmul.f32 %v3214_v24, %v1669_v7  ;;  %v1672_v43 = vadd.f32 %v1638_v2, %v3141_v10  ;;  %v1633_v22 = vadd.f32 %v3208_v54, %v1632_v25 }
 0x740   :  { %v2383_v55 = vpop.f32.mrf.mxu1 }
 0x741   :  { %1732 = vst.msk [vmem:[%s3364_s16 + $0x48] sm:$0xff] %vm128_vm0, %v1716_v1  ;;  %v1715_v30 = vadd.f32 %v3221_v62, %v1692_v26  ;;  %v1695_v57 = vmul.f32 %v3214_v24, %v1672_v43  ;;  %v1671_v58 = vadd.f32 %v1633_v22, %v3132_v50  ;;  %v1648_v59 = vadd.f32 %v2383_v55, %v3208_v54 }
 0x742   :  { %v1642_v60 = vpop.f32.mrf.mxu1 }
 0x743   :  { %1731 = vst.msk [vmem:[%s3364_s16 + $0x40] sm:$0xff] %vm128_vm0, %v1715_v30  ;;  %v1718_v10 = vadd.f32 %v3221_v62, %v1695_v57  ;;  %v1694_v63 = vmul.f32 %v3214_v24, %v1671_v58  ;;  %v1674_v3 = vadd.f32 %v1648_v59, %v3159_v8  ;;  %v1643_v4 = vadd.f32 %v3208_v54, %v1642_v60 }
 0x744   :  { %v2386_v6 = vpop.f32.mrf.mxu1 }
 0x745   :  { %1734 = vst.msk [vmem:[%s3364_s16 + $0x58] sm:$0xff] %vm128_vm0, %v1718_v10  ;;  %v1717_v50 = vadd.f32 %v3221_v62, %v1694_v63  ;;  %v1697_v31 = vmul.f32 %v3214_v24, %v1674_v3  ;;  %v1673_v33 = vadd.f32 %v1643_v4, %v3151_v21  ;;  %v1658_v35 = vadd.f32 %v2386_v6, %v3208_v54 }
 0x746   :  { %v1652_v36 = vpop.f32.mrf.mxu1 }
 0x747   :  { %1733 = vst.msk [vmem:[%s3364_s16 + $0x50] sm:$0xff] %vm128_vm0, %v1717_v50  ;;  %v1720_v8 = vadd.f32 %v3221_v62, %v1697_v31  ;;  %v1696_v37 = vmul.f32 %v3214_v24, %v1673_v33  ;;  %v1676_v39 = vadd.f32 %v1658_v35, %v3171_v51  ;;  %v1653_v41 = vadd.f32 %v3208_v54, %v1652_v36 }
 0x749   :  { %1736 = vst.msk [vmem:[%s3364_s16 + $0x68] sm:$0xff] %vm128_vm0, %v1720_v8  ;;  %v1719_v21 = vadd.f32 %v3221_v62, %v1696_v37  ;;  %v1699_v27 = vmul.f32 %v3214_v24, %v1676_v39  ;;  %v1675_v45 = vadd.f32 %v1653_v41, %v3166_v29 }
 0x74b   :  { %1735 = vst.msk [vmem:[%s3364_s16 + $0x60] sm:$0xff] %vm128_vm0, %v1719_v21  ;;  %v1722_v51 = vadd.f32 %v3221_v62, %v1699_v27  ;;  %v1698_v54 = vmul.f32 %v3214_v24, %v1675_v45 }
 0x74d   :  { %1738 = vst.msk [vmem:[%s3364_s16 + $0x78] sm:$0xff] %vm128_vm0, %v1722_v51  ;;  %v1721_v47 = vadd.f32 %v3221_v62, %v1698_v54 }
 0x74f   :  { %1737 = vst.msk [vmem:[%s3364_s16 + $0x70] sm:$0xff] %vm128_vm0, %v1721_v47 }

</bundles_post_ra>
